<compile_context>
chip_gen: v7x
topology: tpu7x:2x2x1
jax: 0.10.0
libtpu: 0.0.40
codegen_flags: <defaults>
</compile_context>

<pallas_src>
import functools

import jax
import jax.numpy as jnp
from jax.experimental import pallas as pl
from jax.experimental.pallas import tpu as pltpu


# ----------------------------------------------------------------------------- #
# Kernel
# ----------------------------------------------------------------------------- #
def _lstm_fused_kernel(fmess_ref, onehot_ref, wx_ref, wh_ref, wfh_ref, b_ref,
                       out_ref, h_state, c_state, *, hsize, k_nei):
    """One LSTM message-passing step; grid axis 0 iterates over depth."""
    hs = hsize
    d = pl.program_id(0)

    @pl.when(d == 0)
    def _init():
        h_state[...] = jnp.zeros_like(h_state)
        c_state[...] = jnp.zeros_like(c_state)

    x = fmess_ref[...]                       # (N, D)
    h_old = h_state[...]                     # (N, H)
    c_old = c_state[...]                     # (N, H)

    # Forget-gate hidden projection done ONCE per message (gather commutes with
    # the right matmul): fh_all[m] = h_old[m] @ W_f_h.
    fh_all = jnp.dot(h_old, wfh_ref[...], preferred_element_type=jnp.float32)

    # Gather source slab [h | fh | c] -> one (N, 3H) operand per neighbor slot.
    src = jnp.concatenate([h_old, fh_all, c_old], axis=-1)           # (N, 3H)

    # Neighbor gather as 0/1 matmuls on the MXU.  onehot[k] has column 0 zeroed,
    # so the null message (index 0) contributes exactly 0 (== the reference's
    # per-step masking of row 0 before the gather).
    nei = [jnp.dot(onehot_ref[k], src, preferred_element_type=jnp.float32)
           for k in range(k_nei)]                                     # K x (N, 3H)

    h_sum = nei[0][:, 0:hs]
    for k in range(1, k_nei):
        h_sum = h_sum + nei[k][:, 0:hs]                               # (N, H)

    # Fused gate pre-activations: one lane-dense (N, 4H) result.
    gates = (jnp.dot(x, wx_ref[...], preferred_element_type=jnp.float32)
             + jnp.dot(h_sum, wh_ref[...], preferred_element_type=jnp.float32)
             + b_ref[...])                                            # (N, 4H)
    i_g = jax.nn.sigmoid(gates[:, 0 * hs:1 * hs])
    o_g = jax.nn.sigmoid(gates[:, 1 * hs:2 * hs])
    fx = gates[:, 2 * hs:3 * hs]     # x@Wfx + bf (Wh's forget block is zero)
    u_g = jnp.tanh(gates[:, 3 * hs:4 * hs])

    # Per-neighbor forget gating and weighted cell sum.
    fc = jnp.zeros_like(h_old)
    for k in range(k_nei):
        f_k = jax.nn.sigmoid(fx + nei[k][:, hs:2 * hs])
        fc = fc + f_k * nei[k][:, 2 * hs:3 * hs]

    c_new = i_g * u_g + fc
    h_new = o_g * jnp.tanh(c_new)

    h_state[...] = h_new
    c_state[...] = c_new

    # Lane-dense combined output [h | c], stored only once at the last step.
    @pl.when(d == pl.num_programs(0) - 1)
    def _store():
        out_ref[...] = jnp.concatenate([h_new, c_new], axis=-1)


# ----------------------------------------------------------------------------- #
# Wrapper
# ----------------------------------------------------------------------------- #
def _fuse_params(params):
    """Concatenate per-gate weights into lane-dense fused matrices."""
    (wix, wih, bi, wox, woh, bo, wfx, wfh, bf, wux, wuh, bu) = params
    wx = jnp.concatenate([wix, wox, wfx, wux], axis=1)                    # (D, 4H)
    wh = jnp.concatenate([wih, woh, jnp.zeros_like(wfh), wuh], axis=1)    # (H, 4H)
    b4 = jnp.concatenate([bi, bo, bf, bu], axis=1)                        # (1, 4H)
    return wx, wh, wfh, b4


def _build_gather_onehot(bgraph, n):
    """(K, N, N) one-hot gather matrices; column 0 zeroed == null message."""
    cols = jnp.arange(n, dtype=bgraph.dtype)
    oh = (bgraph.T[:, :, None] == cols[None, None, :]).astype(jnp.float32)
    return oh * (cols > 0).astype(jnp.float32)[None, None, :]


@functools.partial(jax.jit, static_argnames=("depth",))
def lstm_forward(fmess, bgraph, params, *, depth):
    """Full forward pass: `depth` message-passing steps in ONE fused kernel."""
    n, d_in = fmess.shape
    k = bgraph.shape[1]
    hs = params[2].shape[-1]

    wx, wh, wfh, b4 = _fuse_params(params)
    onehot = _build_gather_onehot(bgraph, n)                 # (K, N, N)

    cost = pl.CostEstimate(
        flops=2 * depth * n * (hs * hs + k * n * 3 * hs + d_in * 4 * hs + hs * 4 * hs),
        transcendentals=depth * n * hs * (4 + k),
        bytes_accessed=4 * (n * d_in + k * n * n + (d_in + hs) * 4 * hs
                            + hs * hs + 4 * hs + n * 2 * hs),
    )

    grid_spec = pltpu.PrefetchScalarGridSpec(
        num_scalar_prefetch=0,
        grid=(depth,),
        in_specs=[
            pl.BlockSpec((n, d_in), lambda d: (0, 0)),            # fmess
            pl.BlockSpec((k, n, n), lambda d: (0, 0, 0)),         # one-hot gather
            pl.BlockSpec((d_in, 4 * hs), lambda d: (0, 0)),       # Wx fused
            pl.BlockSpec((hs, 4 * hs), lambda d: (0, 0)),         # Wh fused
            pl.BlockSpec((hs, hs), lambda d: (0, 0)),             # Wf (h part)
            pl.BlockSpec((1, 4 * hs), lambda d: (0, 0)),          # biases fused
        ],
        out_specs=pl.BlockSpec((n, 2 * hs), lambda d: (0, 0)),
        scratch_shapes=[pltpu.VMEM((n, hs), jnp.float32),          # h state
                        pltpu.VMEM((n, hs), jnp.float32)],         # c state
    )

    hc = pl.pallas_call(
        functools.partial(_lstm_fused_kernel, hsize=hs, k_nei=k),
        out_shape=jax.ShapeDtypeStruct((n, 2 * hs), jnp.float32),
        grid_spec=grid_spec,
        compiler_params=pltpu.CompilerParams(
            # Depth is a true sequential recurrence -> "arbitrary".
            dimension_semantics=("arbitrary",)),
        cost_estimate=cost,
    )(fmess, onehot, wx, wh, wfh, b4)

    # The reference zeroes the null-message row every step; only the final row-0
    # value is observable, so zero it once here (the gather already ignores it).
    h = hc[:, :hs].at[0, :].set(0.0)
    c = hc[:, hs:].at[0, :].set(0.0)
    return h, c


# ----------------------------------------------------------------------------- #
# Pure-JAX reference (mirrors the PyTorch forward, eval mode)
# ----------------------------------------------------------------------------- #
def lstm_forward_ref(fmess, bgraph, params, depth):
    (wix, wih, bi, wox, woh, bo, wfx, wfh, bf, wux, wuh, bu) = params
    n = fmess.shape[0]
    hs = bi.shape[-1]
    h = jnp.zeros((n, hs), jnp.float32)
    c = jnp.zeros((n, hs), jnp.float32)
    mask = jnp.ones((n, 1), jnp.float32).at[0, 0].set(0.0)
    for _ in range(depth):
        h_nei = h[bgraph]                                   # (N, K, H)
        c_nei = c[bgraph]
        h_sum = h_nei.sum(axis=1)
        i_g = jax.nn.sigmoid(fmess @ wix + h_sum @ wih + bi)
        o_g = jax.nn.sigmoid(fmess @ wox + h_sum @ woh + bo)
        u_g = jnp.tanh(fmess @ wux + h_sum @ wuh + bu)
        fx = fmess @ wfx + bf                               # (N, H)
        fh = jnp.einsum('nkh,hj->nkj', h_nei, wfh)          # (N, K, H)
        f_g = jax.nn.sigmoid(fx[:, None, :] + fh)
        c = i_g * u_g + jnp.sum(f_g * c_nei, axis=1)
        h = o_g * jnp.tanh(c)
        h = h * mask
        c = c * mask
    return h, c


def init_params(key, input_size, hsize):
    """Deterministic init matching nn.Linear(input_size + hsize, hsize) shapes."""
    d, hs = input_size, hsize
    bound = 1.0 / jnp.sqrt(jnp.float32(d + hs))
    keys = jax.random.split(key, 8)
    params = []
    for g in range(4):  # i, o, f, u
        w_full = jax.random.uniform(keys[2 * g], (d + hs, hs),
                                    jnp.float32, -bound, bound)
        b = jax.random.uniform(keys[2 * g + 1], (1, hs),
                               jnp.float32, -bound, bound)
        params += [w_full[:d], w_full[d:], b]
    return tuple(params)


if __name__ == "__main__":
    N, D, H, K, DEPTH = 64, 16, 32, 4, 3

    key = jax.random.PRNGKey(0)
    k_f, k_g, k_p = jax.random.split(key, 3)

    fmess = jax.random.normal(k_f, (N, D), jnp.float32)
    # Neighbor indices; index 0 is the null message (its state stays zero).
    bgraph = jax.random.randint(k_g, (N, K), 0, N, jnp.int32)
    params = init_params(k_p, D, H)

    h, c = lstm_forward(fmess, bgraph, params, depth=DEPTH)
    jax.block_until_ready((h, c))

    h_ref, c_ref = lstm_forward_ref(fmess, bgraph, params, DEPTH)
    assert bool(jnp.allclose(h, h_ref, atol=1e-5, rtol=1e-5))
    assert bool(jnp.allclose(c, c_ref, atol=1e-5, rtol=1e-5))

    print("KERNEL_OK")
</pallas_src>

<mosaic_0001>
module attributes {stable_mosaic.version = 11 : i64} {
  func.func @_lstm_fused_kernel(%arg0: i32, %arg1: memref<64x16xf32, #tpu.memory_space<vmem>>, %arg2: memref<4x64x64xf32, #tpu.memory_space<vmem>>, %arg3: memref<16x128xf32, #tpu.memory_space<vmem>>, %arg4: memref<32x128xf32, #tpu.memory_space<vmem>>, %arg5: memref<32x32xf32, #tpu.memory_space<vmem>>, %arg6: memref<1x128xf32, #tpu.memory_space<vmem>>, %arg7: memref<64x64xf32, #tpu.memory_space<vmem>>, %arg8: memref<64x32xf32, #tpu.memory_space<vmem>>, %arg9: memref<64x32xf32, #tpu.memory_space<vmem>>) attributes {dimension_semantics = [#tpu.dimension_semantics<arbitrary>], iteration_bounds = array<i64: 3>, scalar_prefetch = 0 : i64, scratch_operands = 2 : i64, tpu.core_type = #tpu.core_type<tc>, window_params = [{pipeline_mode = #tpu.pipeline_mode<synchronous>, transform_indices = @transform_0, window_bounds = array<i64: 64, 16>}, {pipeline_mode = #tpu.pipeline_mode<synchronous>, transform_indices = @transform_1, window_bounds = array<i64: 4, 64, 64>}, {pipeline_mode = #tpu.pipeline_mode<synchronous>, transform_indices = @transform_2, window_bounds = array<i64: 16, 128>}, {pipeline_mode = #tpu.pipeline_mode<synchronous>, transform_indices = @transform_3, window_bounds = array<i64: 32, 128>}, {pipeline_mode = #tpu.pipeline_mode<synchronous>, transform_indices = @transform_4, window_bounds = array<i64: 32, 32>}, {pipeline_mode = #tpu.pipeline_mode<synchronous>, transform_indices = @transform_5, window_bounds = array<i64: 1, 128>}, {pipeline_mode = #tpu.pipeline_mode<synchronous>, transform_indices = @transform_6, window_bounds = array<i64: 64, 64>}]} {
    %c0_i32 = arith.constant 0 : i32
    %0 = arith.cmpi eq, %arg0, %c0_i32 : i32
    %1 = arith.extui %0 : i1 to i32
    %c0_i32_0 = arith.constant 0 : i32
    %2 = arith.cmpi ne, %1, %c0_i32_0 : i32
    scf.if %2 {
      %cst_41 = arith.constant 0.000000e+00 : f32
      %101 = vector.broadcast %cst_41 : f32 to vector<64x32xf32>
      %c0_42 = arith.constant 0 : index
      %c0_43 = arith.constant 0 : index
      %102 = vector.load %arg8[%c0_42, %c0_43] : memref<64x32xf32, #tpu.memory_space<vmem>>, vector<64x32xf32>
      tpu.vector_store %arg8[%c0_42, %c0_43], %101 {strides = array<i32>} : memref<64x32xf32, #tpu.memory_space<vmem>>, vector<64x32xf32>,
      %cst_44 = arith.constant 0.000000e+00 : f32
      %103 = vector.broadcast %cst_44 : f32 to vector<64x32xf32>
      %c0_45 = arith.constant 0 : index
      %c0_46 = arith.constant 0 : index
      %104 = vector.load %arg9[%c0_45, %c0_46] : memref<64x32xf32, #tpu.memory_space<vmem>>, vector<64x32xf32>
      tpu.vector_store %arg9[%c0_45, %c0_46], %103 {strides = array<i32>} : memref<64x32xf32, #tpu.memory_space<vmem>>, vector<64x32xf32>,
    } else {
    }
    %c0 = arith.constant 0 : index
    %c0_1 = arith.constant 0 : index
    %3 = vector.load %arg1[%c0, %c0_1] : memref<64x16xf32, #tpu.memory_space<vmem>>, vector<64x16xf32>
    %c0_2 = arith.constant 0 : index
    %c0_3 = arith.constant 0 : index
    %4 = vector.load %arg8[%c0_2, %c0_3] : memref<64x32xf32, #tpu.memory_space<vmem>>, vector<64x32xf32>
    %c0_4 = arith.constant 0 : index
    %c0_5 = arith.constant 0 : index
    %5 = vector.load %arg9[%c0_4, %c0_5] : memref<64x32xf32, #tpu.memory_space<vmem>>, vector<64x32xf32>
    %c0_6 = arith.constant 0 : index
    %c0_7 = arith.constant 0 : index
    %6 = vector.load %arg5[%c0_6, %c0_7] : memref<32x32xf32, #tpu.memory_space<vmem>>, vector<32x32xf32>
    %cst = arith.constant dense<0.000000e+00> : vector<64x32xf32>
    %7 = tpu.matmul %4, %6, %cst {dimension_numbers = #tpu.dot_dimension_numbers<[1], [0], [0], [1], [0, 0, 1, 1], [], []>} : vector<64x32xf32>, vector<32x32xf32>, vector<64x32xf32> -> vector<64x32xf32>
    %8 = tpu.concatenate %4, %7, %5 in 1 : vector<64x32xf32>, vector<64x32xf32>, vector<64x32xf32> -> vector<64x96xf32>
    %c0_8 = arith.constant 0 : index
    %c0_9 = arith.constant 0 : index
    %c0_10 = arith.constant 0 : index
    %9 = vector.load %arg2[%c0_8, %c0_9, %c0_10] : memref<4x64x64xf32, #tpu.memory_space<vmem>>, vector<1x64x64xf32>
    %10 = vector.shape_cast %9 : vector<1x64x64xf32> to vector<64x64xf32>
    %cst_11 = arith.constant dense<0.000000e+00> : vector<64x96xf32>
    %11 = tpu.matmul %10, %8, %cst_11 {dimension_numbers = #tpu.dot_dimension_numbers<[1], [0], [0], [1], [0, 0, 1, 1], [], []>} : vector<64x64xf32>, vector<64x96xf32>, vector<64x96xf32> -> vector<64x96xf32>
    %c1 = arith.constant 1 : index
    %c0_12 = arith.constant 0 : index
    %c0_13 = arith.constant 0 : index
    %12 = vector.load %arg2[%c1, %c0_12, %c0_13] : memref<4x64x64xf32, #tpu.memory_space<vmem>>, vector<1x64x64xf32>
    %13 = vector.shape_cast %12 : vector<1x64x64xf32> to vector<64x64xf32>
    %cst_14 = arith.constant dense<0.000000e+00> : vector<64x96xf32>
    %14 = tpu.matmul %13, %8, %cst_14 {dimension_numbers = #tpu.dot_dimension_numbers<[1], [0], [0], [1], [0, 0, 1, 1], [], []>} : vector<64x64xf32>, vector<64x96xf32>, vector<64x96xf32> -> vector<64x96xf32>
    %c2 = arith.constant 2 : index
    %c0_15 = arith.constant 0 : index
    %c0_16 = arith.constant 0 : index
    %15 = vector.load %arg2[%c2, %c0_15, %c0_16] : memref<4x64x64xf32, #tpu.memory_space<vmem>>, vector<1x64x64xf32>
    %16 = vector.shape_cast %15 : vector<1x64x64xf32> to vector<64x64xf32>
    %cst_17 = arith.constant dense<0.000000e+00> : vector<64x96xf32>
    %17 = tpu.matmul %16, %8, %cst_17 {dimension_numbers = #tpu.dot_dimension_numbers<[1], [0], [0], [1], [0, 0, 1, 1], [], []>} : vector<64x64xf32>, vector<64x96xf32>, vector<64x96xf32> -> vector<64x96xf32>
    %c3 = arith.constant 3 : index
    %c0_18 = arith.constant 0 : index
    %c0_19 = arith.constant 0 : index
    %18 = vector.load %arg2[%c3, %c0_18, %c0_19] : memref<4x64x64xf32, #tpu.memory_space<vmem>>, vector<1x64x64xf32>
    %19 = vector.shape_cast %18 : vector<1x64x64xf32> to vector<64x64xf32>
    %cst_20 = arith.constant dense<0.000000e+00> : vector<64x96xf32>
    %20 = tpu.matmul %19, %8, %cst_20 {dimension_numbers = #tpu.dot_dimension_numbers<[1], [0], [0], [1], [0, 0, 1, 1], [], []>} : vector<64x64xf32>, vector<64x96xf32>, vector<64x96xf32> -> vector<64x96xf32>
    %21 = vector.extract_strided_slice %11 {offsets = [0, 0], sizes = [64, 32], strides = [1, 1]} : vector<64x96xf32> to vector<64x32xf32>
    %22 = vector.extract_strided_slice %14 {offsets = [0, 0], sizes = [64, 32], strides = [1, 1]} : vector<64x96xf32> to vector<64x32xf32>
    %23 = arith.addf %21, %22 : vector<64x32xf32>
    %24 = vector.extract_strided_slice %17 {offsets = [0, 0], sizes = [64, 32], strides = [1, 1]} : vector<64x96xf32> to vector<64x32xf32>
    %25 = arith.addf %23, %24 : vector<64x32xf32>
    %26 = vector.extract_strided_slice %20 {offsets = [0, 0], sizes = [64, 32], strides = [1, 1]} : vector<64x96xf32> to vector<64x32xf32>
    %27 = arith.addf %25, %26 : vector<64x32xf32>
    %c0_21 = arith.constant 0 : index
    %c0_22 = arith.constant 0 : index
    %28 = vector.load %arg3[%c0_21, %c0_22] : memref<16x128xf32, #tpu.memory_space<vmem>>, vector<16x128xf32>
    %cst_23 = arith.constant dense<0.000000e+00> : vector<64x128xf32>
    %29 = tpu.matmul %3, %28, %cst_23 {dimension_numbers = #tpu.dot_dimension_numbers<[1], [0], [0], [1], [0, 0, 1, 1], [], []>} : vector<64x16xf32>, vector<16x128xf32>, vector<64x128xf32> -> vector<64x128xf32>
    %c0_24 = arith.constant 0 : index
    %c0_25 = arith.constant 0 : index
    %30 = vector.load %arg4[%c0_24, %c0_25] : memref<32x128xf32, #tpu.memory_space<vmem>>, vector<32x128xf32>
    %cst_26 = arith.constant dense<0.000000e+00> : vector<64x128xf32>
    %31 = tpu.matmul %27, %30, %cst_26 {dimension_numbers = #tpu.dot_dimension_numbers<[1], [0], [0], [1], [0, 0, 1, 1], [], []>} : vector<64x32xf32>, vector<32x128xf32>, vector<64x128xf32> -> vector<64x128xf32>
    %32 = arith.addf %29, %31 : vector<64x128xf32>
    %c0_27 = arith.constant 0 : index
    %c0_28 = arith.constant 0 : index
    %33 = vector.load %arg6[%c0_27, %c0_28] : memref<1x128xf32, #tpu.memory_space<vmem>>, vector<1x128xf32>
    %34 = vector.broadcast %33 : vector<1x128xf32> to vector<64x128xf32>
    %35 = arith.addf %32, %34 : vector<64x128xf32>
    %36 = vector.extract_strided_slice %35 {offsets = [0, 0], sizes = [64, 32], strides = [1, 1]} : vector<64x128xf32> to vector<64x32xf32>
    %37 = arith.negf %36 : vector<64x32xf32>
    %38 = math.exp %37 : vector<64x32xf32>
    %cst_29 = arith.constant 1.000000e+00 : f32
    %39 = vector.broadcast %cst_29 : f32 to vector<64x32xf32>
    %40 = arith.addf %39, %38 : vector<64x32xf32>
    %41 = arith.divf %39, %40 : vector<64x32xf32>
    %42 = vector.extract_strided_slice %35 {offsets = [0, 32], sizes = [64, 32], strides = [1, 1]} : vector<64x128xf32> to vector<64x32xf32>
    %43 = arith.negf %42 : vector<64x32xf32>
    %44 = math.exp %43 : vector<64x32xf32>
    %cst_30 = arith.constant 1.000000e+00 : f32
    %45 = vector.broadcast %cst_30 : f32 to vector<64x32xf32>
    %46 = arith.addf %45, %44 : vector<64x32xf32>
    %47 = arith.divf %45, %46 : vector<64x32xf32>
    %48 = vector.extract_strided_slice %35 {offsets = [0, 64], sizes = [64, 32], strides = [1, 1]} : vector<64x128xf32> to vector<64x32xf32>
    %49 = vector.extract_strided_slice %35 {offsets = [0, 96], sizes = [64, 32], strides = [1, 1]} : vector<64x128xf32> to vector<64x32xf32>
    %50 = math.tanh %49 : vector<64x32xf32>
    %cst_31 = arith.constant 0.000000e+00 : f32
    %51 = vector.broadcast %cst_31 : f32 to vector<64x32xf32>
    %52 = vector.extract_strided_slice %11 {offsets = [0, 32], sizes = [64, 32], strides = [1, 1]} : vector<64x96xf32> to vector<64x32xf32>
    %53 = arith.addf %48, %52 : vector<64x32xf32>
    %54 = arith.negf %53 : vector<64x32xf32>
    %55 = math.exp %54 : vector<64x32xf32>
    %cst_32 = arith.constant 1.000000e+00 : f32
    %56 = vector.broadcast %cst_32 : f32 to vector<64x32xf32>
    %57 = arith.addf %56, %55 : vector<64x32xf32>
    %58 = arith.divf %56, %57 : vector<64x32xf32>
    %59 = vector.extract_strided_slice %11 {offsets = [0, 64], sizes = [64, 32], strides = [1, 1]} : vector<64x96xf32> to vector<64x32xf32>
    %60 = arith.mulf %58, %59 : vector<64x32xf32>
    %61 = arith.addf %51, %60 : vector<64x32xf32>
    %62 = vector.extract_strided_slice %14 {offsets = [0, 32], sizes = [64, 32], strides = [1, 1]} : vector<64x96xf32> to vector<64x32xf32>
    %63 = arith.addf %48, %62 : vector<64x32xf32>
    %64 = arith.negf %63 : vector<64x32xf32>
    %65 = math.exp %64 : vector<64x32xf32>
    %cst_33 = arith.constant 1.000000e+00 : f32
    %66 = vector.broadcast %cst_33 : f32 to vector<64x32xf32>
    %67 = arith.addf %66, %65 : vector<64x32xf32>
    %68 = arith.divf %66, %67 : vector<64x32xf32>
    %69 = vector.extract_strided_slice %14 {offsets = [0, 64], sizes = [64, 32], strides = [1, 1]} : vector<64x96xf32> to vector<64x32xf32>
    %70 = arith.mulf %68, %69 : vector<64x32xf32>
    %71 = arith.addf %61, %70 : vector<64x32xf32>
    %72 = vector.extract_strided_slice %17 {offsets = [0, 32], sizes = [64, 32], strides = [1, 1]} : vector<64x96xf32> to vector<64x32xf32>
    %73 = arith.addf %48, %72 : vector<64x32xf32>
    %74 = arith.negf %73 : vector<64x32xf32>
    %75 = math.exp %74 : vector<64x32xf32>
    %cst_34 = arith.constant 1.000000e+00 : f32
    %76 = vector.broadcast %cst_34 : f32 to vector<64x32xf32>
    %77 = arith.addf %76, %75 : vector<64x32xf32>
    %78 = arith.divf %76, %77 : vector<64x32xf32>
    %79 = vector.extract_strided_slice %17 {offsets = [0, 64], sizes = [64, 32], strides = [1, 1]} : vector<64x96xf32> to vector<64x32xf32>
    %80 = arith.mulf %78, %79 : vector<64x32xf32>
    %81 = arith.addf %71, %80 : vector<64x32xf32>
    %82 = vector.extract_strided_slice %20 {offsets = [0, 32], sizes = [64, 32], strides = [1, 1]} : vector<64x96xf32> to vector<64x32xf32>
    %83 = arith.addf %48, %82 : vector<64x32xf32>
    %84 = arith.negf %83 : vector<64x32xf32>
    %85 = math.exp %84 : vector<64x32xf32>
    %cst_35 = arith.constant 1.000000e+00 : f32
    %86 = vector.broadcast %cst_35 : f32 to vector<64x32xf32>
    %87 = arith.addf %86, %85 : vector<64x32xf32>
    %88 = arith.divf %86, %87 : vector<64x32xf32>
    %89 = vector.extract_strided_slice %20 {offsets = [0, 64], sizes = [64, 32], strides = [1, 1]} : vector<64x96xf32> to vector<64x32xf32>
    %90 = arith.mulf %88, %89 : vector<64x32xf32>
    %91 = arith.addf %81, %90 : vector<64x32xf32>
    %92 = arith.mulf %41, %50 : vector<64x32xf32>
    %93 = arith.addf %92, %91 : vector<64x32xf32>
    %94 = math.tanh %93 : vector<64x32xf32>
    %95 = arith.mulf %47, %94 : vector<64x32xf32>
    %c0_36 = arith.constant 0 : index
    %c0_37 = arith.constant 0 : index
    %96 = vector.load %arg8[%c0_36, %c0_37] : memref<64x32xf32, #tpu.memory_space<vmem>>, vector<64x32xf32>
    tpu.vector_store %arg8[%c0_36, %c0_37], %95 {strides = array<i32>} : memref<64x32xf32, #tpu.memory_space<vmem>>, vector<64x32xf32>,
    %c0_38 = arith.constant 0 : index
    %c0_39 = arith.constant 0 : index
    %97 = vector.load %arg9[%c0_38, %c0_39] : memref<64x32xf32, #tpu.memory_space<vmem>>, vector<64x32xf32>
    tpu.vector_store %arg9[%c0_38, %c0_39], %93 {strides = array<i32>} : memref<64x32xf32, #tpu.memory_space<vmem>>, vector<64x32xf32>,
    %c2_i32 = arith.constant 2 : i32
    %98 = arith.cmpi eq, %arg0, %c2_i32 : i32
    %99 = arith.extui %98 : i1 to i32
    %c0_i32_40 = arith.constant 0 : i32
    %100 = arith.cmpi ne, %99, %c0_i32_40 : i32
    scf.if %100 {
      %101 = tpu.concatenate %95, %93 in 1 : vector<64x32xf32>, vector<64x32xf32> -> vector<64x64xf32>
      %c0_41 = arith.constant 0 : index
      %c0_42 = arith.constant 0 : index
      %102 = vector.load %arg7[%c0_41, %c0_42] : memref<64x64xf32, #tpu.memory_space<vmem>>, vector<64x64xf32>
      tpu.vector_store %arg7[%c0_41, %c0_42], %101 {strides = array<i32>} : memref<64x64xf32, #tpu.memory_space<vmem>>, vector<64x64xf32>,
    } else {
    }
    return
  }
  func.func @transform_0(%arg0: i32) -> (i32, i32) {
    %c0_i32 = arith.constant 0 : i32
    %c0_i32_0 = arith.constant 0 : i32
    %c0_i32_1 = arith.constant 0 : i32
    return %c0_i32, %c0_i32_0 : i32, i32
  }
  func.func @transform_1(%arg0: i32) -> (i32, i32, i32) {
    %c0_i32 = arith.constant 0 : i32
    %c0_i32_0 = arith.constant 0 : i32
    %c0_i32_1 = arith.constant 0 : i32
    %c0_i32_2 = arith.constant 0 : i32
    return %c0_i32, %c0_i32_0, %c0_i32_1 : i32, i32, i32
  }
  func.func @transform_2(%arg0: i32) -> (i32, i32) {
    %c0_i32 = arith.constant 0 : i32
    %c0_i32_0 = arith.constant 0 : i32
    %c0_i32_1 = arith.constant 0 : i32
    return %c0_i32, %c0_i32_0 : i32, i32
  }
  func.func @transform_3(%arg0: i32) -> (i32, i32) {
    %c0_i32 = arith.constant 0 : i32
    %c0_i32_0 = arith.constant 0 : i32
    %c0_i32_1 = arith.constant 0 : i32
    return %c0_i32, %c0_i32_0 : i32, i32
  }
  func.func @transform_4(%arg0: i32) -> (i32, i32) {
    %c0_i32 = arith.constant 0 : i32
    %c0_i32_0 = arith.constant 0 : i32
    %c0_i32_1 = arith.constant 0 : i32
    return %c0_i32, %c0_i32_0 : i32, i32
  }
  func.func @transform_5(%arg0: i32) -> (i32, i32) {
    %c0_i32 = arith.constant 0 : i32
    %c0_i32_0 = arith.constant 0 : i32
    %c0_i32_1 = arith.constant 0 : i32
    return %c0_i32, %c0_i32_0 : i32, i32
  }
  func.func @transform_6(%arg0: i32) -> (i32, i32) {
    %c0_i32 = arith.constant 0 : i32
    %c0_i32_0 = arith.constant 0 : i32
    %c0_i32_1 = arith.constant 0 : i32
    return %c0_i32, %c0_i32_0 : i32, i32
  }
}

</mosaic_0001>

<bundles_post_ra>
// kernel: lstm_forward.1
= control target key start
LH: loop header
LB: loop body
LE: loop exit
PB: predicated region body
PF: predicated region fallthrough
CT: control target
= control target key end

     0   :  { %s2831_s21 = smov 0   ;;  %s3649_s0 = inlined_call_operand.vmem [shape: f32[64,16], index: 0, kind: input, shape index: {}]   ;;  %s3650_s1 = inlined_call_operand.vmem [shape: f32[4,64,64], index: 1, kind: input, shape index: {}]   ;;  %s3651_s2 = inlined_call_operand.vmem [shape: f32[16,128], index: 2, kind: input, shape index: {}]   ;;  %s3652_s3 = inlined_call_operand.vmem [shape: f32[32,128], index: 3, kind: input, shape index: {}]   ;;  %s3653_s4 = inlined_call_operand.vmem [shape: f32[32,32], index: 4, kind: input, shape index: {}]   ;;  %s3654_s5 = inlined_call_operand.vmem [shape: f32[1,128], index: 5, kind: input, shape index: {}]   ;;  %s3655_s6 = inlined_call_operand.vmem [shape: f32[64,64], index: 6, kind: output, shape index: {}]  }
   0x1 LB: > { %s2048_s22 = sadd.s32 4294967295, %s2789_s21   ;;  %p2050_p0 = scmp.ge.s32.totalorder %s2789_s21, 1  ;;  %s2789_s21 = sphi %s2831_s21, %s16_s21  }
   0x2   : > { %p197_p1 = scmp.lt.s32.totalorder %s2789_s21, 4 }
   0x4   : > { %p198_p2 = pnand %p2050_p0, %p197_p1 }
   0x6   : > { %201 = sbr.rel (%p198_p2) target bundleno = 1327 (0x52f), region = 44 }
   0xd   : > { %p2051_p3 = scmp.ne.s32.totalorder %s2048_s22, 0 }
   0xe   : > { %vm221_vm0 = vcmask (!%p2051_p3), 261120   ;;  %v2791_v0 = vmov (!%p2051_p3), 0.0  }
   0xf   : > { %220 = sbr.rel (%p2051_p3) target bundleno = 23 (0x17), region = 48  ;;  %222 = vst.msk [vmem:[#allocation2] sm:$0xff] (!%p2051_p3), %vm221_vm0, %v2791_v0  ;;  %223 = vst.msk [vmem:[#allocation2 + $0x8] sm:$0xff] (!%p2051_p3), %vm221_vm0, %v2791_v0 }
  0x10   : > { %224 = vst.msk [vmem:[#allocation2 + $0x10] sm:$0xff] (!%p2051_p3), %vm221_vm0, %v2791_v0  ;;  %225 = vst.msk [vmem:[#allocation2 + $0x18] sm:$0xff] (!%p2051_p3), %vm221_vm0, %v2791_v0 }
  0x11   : > { %226 = vst.msk [vmem:[#allocation2 + $0x20] sm:$0xff] (!%p2051_p3), %vm221_vm0, %v2791_v0  ;;  %227 = vst.msk [vmem:[#allocation2 + $0x28] sm:$0xff] (!%p2051_p3), %vm221_vm0, %v2791_v0 }
  0x12   : > { %228 = vst.msk [vmem:[#allocation2 + $0x30] sm:$0xff] (!%p2051_p3), %vm221_vm0, %v2791_v0  ;;  %229 = vst.msk [vmem:[#allocation2 + $0x38] sm:$0xff] (!%p2051_p3), %vm221_vm0, %v2791_v0 }
  0x13   : > { %230 = vst.msk [vmem:[#allocation3] sm:$0xff] (!%p2051_p3), %vm221_vm0, %v2791_v0  ;;  %231 = vst.msk [vmem:[#allocation3 + $0x8] sm:$0xff] (!%p2051_p3), %vm221_vm0, %v2791_v0 }
  0x14   : > { %232 = vst.msk [vmem:[#allocation3 + $0x10] sm:$0xff] (!%p2051_p3), %vm221_vm0, %v2791_v0  ;;  %233 = vst.msk [vmem:[#allocation3 + $0x18] sm:$0xff] (!%p2051_p3), %vm221_vm0, %v2791_v0 }
  0x15   : > { %234 = vst.msk [vmem:[#allocation3 + $0x20] sm:$0xff] (!%p2051_p3), %vm221_vm0, %v2791_v0  ;;  %235 = vst.msk [vmem:[#allocation3 + $0x28] sm:$0xff] (!%p2051_p3), %vm221_vm0, %v2791_v0 }
  0x16   : > { %236 = vst.msk [vmem:[#allocation3 + $0x30] sm:$0xff] %vm221_vm0, %v2791_v0  ;;  %237 = vst.msk [vmem:[#allocation3 + $0x38] sm:$0xff] %vm221_vm0, %v2791_v0 }
  0x17 PF: > { %v262_v1 = vld [vmem:[%s3653_s4] sm:$0xff]  ;;  %v263_v2 = vld [vmem:[%s3653_s4 + $0x8] sm:$0xff]  ;;  %v264_v3 = vld [vmem:[%s3653_s4 + $0x10] sm:$0xff]  ;;  %vm266_vm1 = vcmask 261120   ;;  %s2792_s7 = smov 32   ;;  %s2793_s8 = smov 64  }
  0x18   : > { %v2442_v4 = vpack.c.bf16 %v263_v2, %v262_v1  ;;  %v265_v5 = vld [vmem:[%s3653_s4 + $0x18] sm:$0xff]  ;;  %v2869_v6 = vld [vmem:[#allocation2] sm:$0xff]  ;;  %v247_v8 = vld [vmem:[#allocation2 + $0x8] sm:$0xff]  ;;  %vm468_vm2 = vcmask 523264   ;;  %vm1187_vm3 = vcmask 130048   ;;  %p2173_p4 = scmp.ne.s32.totalorder %s2048_s22, 2 }
  0x19   : > { %v2446_v7 = vpack.c.bf16 %v265_v5, %v264_v3  ;;  %2282 = vmatprep.mubr.msk.f32.mxu0 %vm266_vm1, %v2869_v6  ;;  %v2873_v9 = vld [vmem:[#allocation2 + $0x10] sm:$0xff]  ;;  %v2878_v10 = vld [vmem:[#allocation2 + $0x18] sm:$0xff]  ;;  %v2880_v11 = vld [vmem:[#allocation2 + $0x20] sm:$0xff] }
  0x1a   : > { %2443 = vmatprep.subr.bf16.mxu0 %v2442_v4  ;;  %v2886_v12 = vld [vmem:[#allocation2 + $0x28] sm:$0xff]  ;;  %v2888_v13 = vld [vmem:[#allocation2 + $0x30] sm:$0xff]  ;;  %v2894_v14 = vld [vmem:[#allocation2 + $0x38] sm:$0xff] }
  0x1b   : > { %2445 = vmatpush3.bf16.msra.mxu0 %v2442_v4  ;;  %v254_v17 = vld [vmem:[#allocation3] sm:$0xff]  ;;  %v255_v18 = vld [vmem:[#allocation3 + $0x8] sm:$0xff] }
  0x1c   : > { %2447 = vmatprep.subr.bf16.mxu0 %v2446_v7  ;;  %v2556_v21 = vpack.i.bf16 %v255_v18, %v254_v17  ;;  %v256_v23 = vld [vmem:[#allocation3 + $0x10] sm:$0xff]  ;;  %v257_v24 = vld [vmem:[#allocation3 + $0x18] sm:$0xff]  ;;  %v477_v38 = vld [vmem:[%s3650_s1] sm:$0xff] }
  0x1d   : > { %v2566_v27 = vpack.i.bf16 %v257_v24, %v256_v23  ;;  %v258_v29 = vld [vmem:[#allocation3 + $0x20] sm:$0xff]  ;;  %v259_v30 = vld [vmem:[#allocation3 + $0x28] sm:$0xff]  ;;  %v260_v35 = vld [vmem:[#allocation3 + $0x30] sm:$0xff]  ;;  %2310 = vmatprep.mubr.msk.f32.mxu1 %vm468_vm2, %v477_v38 }
  0x1e   : > { %v2571_v33 = vpack.i.bf16 %v259_v30, %v258_v29  ;;  %v261_v36 = vld [vmem:[#allocation3 + $0x38] sm:$0xff]  ;;  %v2068_v39 = vld [vmem:[%s3650_s1 + $0x40] sm:$0xff]  ;;  %v479_v23 = vld [vmem:[%s3650_s1 + $0x10] sm:$0xff] }
  0x1f   : > { %2449 = vmatpush3.bf16.msra.mxu0 %v2446_v7  ;;  %v2586_v40 = vpack.i.bf16 %v261_v36, %v260_v35  ;;  %v2070_v24 = vld [vmem:[%s3650_s1 + $0x50] sm:$0xff]  ;;  %v482_v29 = vld [vmem:[%s3650_s1 + $0x28] sm:$0xff]  ;;  %v2084_v35 = vld [vmem:[%s3650_s1 + $0x80] sm:$0xff] }
  0x20   : > { %v2073_v30 = vld [vmem:[%s3650_s1 + $0x68] sm:$0xff]  ;;  %v2100_v36 = vld [vmem:[%s3650_s1 + $0xc0] sm:$0xff] }
  0x21   : > { %v2101_v38 = vld [vmem:[%s3650_s1 + $0xc8] sm:$0xff] }
  0x22   : > { %2283 = vmatmul.mubr.msk.f32.vlgmr.msra.gmra.mrb[0].mxu0 %vm266_vm1, %v247_v8 }
  0x23   : > { %2285 = vmatprep.mubr.msk.f32.mxu0 %vm266_vm1, %v2873_v9 }
  0x26   : > { %2286 = vmatmul.mubr.msk.f32.gmra.mrb[2].mxu0 %vm266_vm1, %v2878_v10 }
  0x27   : > { %2288 = vmatprep.mubr.msk.f32.mxu0 %vm266_vm1, %v2880_v11 }
  0x2a   : > { %2289 = vmatmul.mubr.msk.f32.gmra.mrb[4].mxu0 %vm266_vm1, %v2886_v12 }
  0x2b   : > { %2291 = vmatprep.mubr.msk.f32.mxu0 %vm266_vm1, %v2888_v13 }
  0x2e   : > { %2292 = vmatmul.mubr.msk.f32.gmra.mrb[6].mxu0 %vm266_vm1, %v2894_v14 }
  0x2f   : > { %2338 = vmatprep.mubr.msk.f32.mxu0 %vm468_vm2, %v2068_v39  ;;  %v2086_v39 = vld [vmem:[%s3650_s1 + $0x90] sm:$0xff] }
  0xf5   : > { %v2284_v15 = vpop.f32.mrb[0].mxu0 }
  0xf6   : > { %v357_v16 = vpop.f32.mrb[1].mxu0 }
  0xf7   : > { %v2551_v19 = vpack.i.bf16 %v2284_v15, %v357_v16 }
  0xf9   : > { %2552 = vrot.lane.b32.xlu0 %v2551_v19, %s2792_s7  ;;  %v2287_v20 = vpop.f32.mrb[2].mxu0 }
  0xfa   : > { %v367_v22 = vpop.f32.mrb[3].mxu0 }
  0xfb   : > { %v2561_v25 = vpack.i.bf16 %v2287_v20, %v367_v22 }
  0xfd   : > { %2557 = vrot.lane.b32.xlu0 %v2556_v21, %s2793_s8  ;;  %2562 = vrot.lane.b32.xlu1 %v2561_v25, %s2792_s7  ;;  %v2290_v26 = vpop.f32.mrb[4].mxu0  ;;  %v480_v25 = vld [vmem:[%s3650_s1 + $0x18] sm:$0xff] }
  0xfe   : > { %v377_v28 = vpop.f32.mrb[5].mxu0 }
  0xff   : > { %v2576_v31 = vpack.i.bf16 %v2290_v26, %v377_v28  ;;  %v2071_v26 = vld [vmem:[%s3650_s1 + $0x58] sm:$0xff]  ;;  %v2072_v28 = vld [vmem:[%s3650_s1 + $0x60] sm:$0xff] }
 0x101   : > { %2567 = vrot.lane.b32.xlu1 %v2566_v27, %s2793_s8  ;;  %2577 = vrot.lane.b32.xlu0 %v2576_v31, %s2792_s7  ;;  %v2293_v32 = vpop.f32.mrb[6].mxu0  ;;  %v481_v27 = vld [vmem:[%s3650_s1 + $0x20] sm:$0xff]  ;;  %v483_v31 = vld [vmem:[%s3650_s1 + $0x30] sm:$0xff] }
 0x102   : > { %v387_v34 = vpop.f32.mrb[7].mxu0 }
 0x103   : > { %v2581_v37 = vpack.i.bf16 %v2293_v32, %v387_v34  ;;  %v2074_v32 = vld [vmem:[%s3650_s1 + $0x70] sm:$0xff]  ;;  %v2075_v34 = vld [vmem:[%s3650_s1 + $0x78] sm:$0xff] }
 0x105   : > { %2572 = vrot.lane.b32.xlu1 %v2571_v33, %s2793_s8  ;;  %2582 = vrot.lane.b32.xlu0 %v2581_v37, %s2792_s7  ;;  %v484_v33 = vld [vmem:[%s3650_s1 + $0x38] sm:$0xff]  ;;  %v2085_v37 = vld [vmem:[%s3650_s1 + $0x88] sm:$0xff] }
 0x109   : > { %2587 = vrot.lane.b32.xlu1 %v2586_v40, %s2793_s8  ;;  %v2102_v40 = vld [vmem:[%s3650_s1 + $0xd0] sm:$0xff] }
 0x16b   : > { %v2553_v41 = vpop.permute.xlu0 %2552 }
 0x16c   : > { %v2555_v42 = vunpack.i.h.bf16 %v2553_v41  ;;  %v2554_v43 = vunpack.i.l.bf16 %v2553_v41  ;;  %v2087_v41 = vld [vmem:[%s3650_s1 + $0x98] sm:$0xff] }
 0x16e   : > { %v461_v48 = vsel %vm266_vm1, %v247_v8, %v2555_v42  ;;  %v460_v49 = vsel %vm266_vm1, %v2869_v6, %v2554_v43  ;;  %v2103_v42 = vld [vmem:[%s3650_s1 + $0xd8] sm:$0xff]  ;;  %v2088_v43 = vld [vmem:[%s3650_s1 + $0xa0] sm:$0xff] }
 0x16f   : > { %v2558_v44 = vpop.permute.xlu0 %2557  ;;  %v2563_v45 = vpop.permute.xlu1 %2562 }
 0x170   : > { %v2560_v46 = vunpack.i.h.bf16 %v2558_v44  ;;  %v2559_v47 = vunpack.i.l.bf16 %v2558_v44  ;;  %v2565_v50 = vunpack.i.h.bf16 %v2563_v45  ;;  %v2564_v51 = vunpack.i.l.bf16 %v2563_v45  ;;  %v2104_v44 = vld [vmem:[%s3650_s1 + $0xe0] sm:$0xff]  ;;  %v2089_v45 = vld [vmem:[%s3650_s1 + $0xa8] sm:$0xff] }
 0x172   : > { %v469_v52 = vsel %vm468_vm2, %v460_v49, %v2559_v47  ;;  %v470_v53 = vsel %vm468_vm2, %v461_v48, %v2560_v46  ;;  %v463_v61 = vsel %vm266_vm1, %v2878_v10, %v2565_v50  ;;  %v462_v62 = vsel %vm266_vm1, %v2873_v9, %v2564_v51  ;;  %v2105_v46 = vld [vmem:[%s3650_s1 + $0xe8] sm:$0xff]  ;;  %v2090_v47 = vld [vmem:[%s3650_s1 + $0xb0] sm:$0xff]  ;;  %v2091_v49 = vld [vmem:[%s3650_s1 + $0xb8] sm:$0xff] }
 0x173   : > { %v2450_v54 = vpack.c.bf16 %v470_v53, %v469_v52  ;;  %v2568_v55 = vpop.permute.xlu1 %2567  ;;  %v2578_v56 = vpop.permute.xlu0 %2577  ;;  %v2106_v48 = vld [vmem:[%s3650_s1 + $0xf0] sm:$0xff]  ;;  %v2107_v50 = vld [vmem:[%s3650_s1 + $0xf8] sm:$0xff]  ;;  %v1054_v51 = vld [vmem:[%s3652_s3] sm:$0xff] }
 0x174   : > { %v2570_v57 = vunpack.i.h.bf16 %v2568_v55  ;;  %v2569_v58 = vunpack.i.l.bf16 %v2568_v55  ;;  %v2580_v59 = vunpack.i.h.bf16 %v2578_v56  ;;  %v2579_v60 = vunpack.i.l.bf16 %v2578_v56  ;;  %v1055_v52 = vld [vmem:[%s3652_s3 + $0x8] sm:$0xff]  ;;  %v1057_v55 = vld [vmem:[%s3652_s3 + $0x18] sm:$0xff] }
 0x175   : > { %2451 = vmatprep.subr.bf16.mxu1 %v2450_v54  ;;  %2467 = vmatprep.subr.bf16.mxu0 %v2450_v54  ;;  %v2514_v53 = vpack.c.bf16 %v1055_v52, %v1054_v51  ;;  %v238_v52 = vld [vmem:[%s3649_s0] sm:$0xff] }
 0x176   : > { %v471_v63 = vsel %vm468_vm2, %v462_v62, %v2569_v58  ;;  %v472_v0 = vsel %vm468_vm2, %v463_v61, %v2570_v57  ;;  %2453 = vmatpush3.bf16.msra.mxu1 %v2450_v54  ;;  %v465_v2 = vsel %vm266_vm1, %v2886_v12, %v2580_v59  ;;  %v464_v3 = vsel %vm266_vm1, %v2880_v11, %v2579_v60  ;;  %v1052_v57 = vld [vmem:[%s3651_s2] sm:$0xff]  ;;  %v1053_v58 = vld [vmem:[%s3651_s2 + $0x8] sm:$0xff] }
 0x177   : > { %v2454_v1 = vpack.c.bf16 %v472_v0, %v471_v63  ;;  %2469 = vmatpush3.bf16.msra.mxu0 %v2450_v54  ;;  %v2573_v4 = vpop.permute.xlu1 %2572  ;;  %v2583_v5 = vpop.permute.xlu0 %2582  ;;  %v3075_v59 = vpack.c.bf16 %v1053_v58, %v1052_v57  ;;  %v243_v57 = vld [vmem:[%s3649_s0 + $0x28] sm:$0xff]  ;;  %v244_v58 = vld [vmem:[%s3649_s0 + $0x30] sm:$0xff] }
 0x178   : > { %v2575_v6 = vunpack.i.h.bf16 %v2573_v4  ;;  %v2574_v7 = vunpack.i.l.bf16 %v2573_v4  ;;  %v2585_v8 = vunpack.i.h.bf16 %v2583_v5  ;;  %v2584_v9 = vunpack.i.l.bf16 %v2583_v5 }
 0x179   : > { %2455 = vmatprep.subr.bf16.mxu1 %v2454_v1  ;;  %2471 = vmatprep.subr.bf16.mxu0 %v2454_v1 }
 0x17a   : > { %v473_v10 = vsel %vm468_vm2, %v464_v3, %v2574_v7  ;;  %v474_v15 = vsel %vm468_vm2, %v465_v2, %v2575_v6  ;;  %2457 = vmatpush3.bf16.msra.mxu1 %v2454_v1  ;;  %v467_v12 = vsel %vm266_vm1, %v2894_v14, %v2585_v8  ;;  %v466_v11 = vsel %vm266_vm1, %v2888_v13, %v2584_v9  ;;  %v478_v13 = vld [vmem:[%s3650_s1 + $0x8] sm:$0xff] }
 0x17b   : > { %v2458_v16 = vpack.c.bf16 %v474_v15, %v473_v10  ;;  %2473 = vmatpush3.bf16.msra.mxu0 %v2454_v1  ;;  %v2588_v17 = vpop.permute.xlu1 %2587  ;;  %v2069_v14 = vld [vmem:[%s3650_s1 + $0x48] sm:$0xff] }
 0x17c   : > { %v2590_v18 = vunpack.i.h.bf16 %v2588_v17  ;;  %v2589_v19 = vunpack.i.l.bf16 %v2588_v17 }
 0x17d   : > { %2459 = vmatprep.subr.bf16.mxu1 %v2458_v16  ;;  %2475 = vmatprep.subr.bf16.mxu0 %v2458_v16 }
 0x17e   : > { %v475_v20 = vsel %vm468_vm2, %v466_v11, %v2589_v19  ;;  %v476_v21 = vsel %vm468_vm2, %v467_v12, %v2590_v18  ;;  %2461 = vmatpush3.bf16.msra.mxu1 %v2458_v16 }
 0x17f   : > { %v2462_v22 = vpack.c.bf16 %v476_v21, %v475_v20  ;;  %2477 = vmatpush3.bf16.msra.mxu0 %v2458_v16 }
 0x181   : > { %2463 = vmatprep.subr.bf16.mxu1 %v2462_v22  ;;  %2479 = vmatprep.subr.bf16.mxu0 %v2462_v22 }
 0x182   : > { %2465 = vmatpush3.bf16.msra.mxu1 %v2462_v22 }
 0x183   : > { %2481 = vmatpush3.bf16.msra.mxu0 %v2462_v22  ;;  %2483 = vmatprep.subr.bf16.mxu1 %v2450_v54 }
 0x184   : > { %2499 = vmatprep.subr.bf16.mxu0 %v2450_v54 }
 0x185   : > { %2311 = vmatmul.mubr.msk.f32.vlgmr.msra.gmra.mrb[0].mxu1 %vm468_vm2, %v478_v13 }
 0x186   : > { %2339 = vmatmul.mubr.msk.f32.vlgmr.msra.gmra.mrb[8].mxu0 %vm468_vm2, %v2069_v14  ;;  %2485 = vmatpush3.bf16.msra.mxu1 %v2450_v54 }
 0x187   : > { %2501 = vmatpush3.bf16.msra.mxu0 %v2450_v54  ;;  %2487 = vmatprep.subr.bf16.mxu1 %v2454_v1  ;;  %v1056_v54 = vld [vmem:[%s3652_s3 + $0x10] sm:$0xff] }
 0x188   : > { %2503 = vmatprep.subr.bf16.mxu0 %v2454_v1  ;;  %2313 = vmatprep.mubr.msk.f32.mxu1 %vm468_vm2, %v479_v23  ;;  %v2518_v56 = vpack.c.bf16 %v1057_v55, %v1056_v54  ;;  %v240_v54 = vld [vmem:[%s3649_s0 + $0x10] sm:$0xff]  ;;  %v241_v55 = vld [vmem:[%s3649_s0 + $0x18] sm:$0xff] }
 0x189   : > { %2341 = vmatprep.mubr.msk.f32.mxu0 %vm468_vm2, %v2070_v24  ;;  %2314 = vmatmul.mubr.msk.f32.gmra.mrb[2].mxu1 %vm468_vm2, %v480_v25 }
 0x18a   : > { %2342 = vmatmul.mubr.msk.f32.gmra.mrb[10].mxu0 %vm468_vm2, %v2071_v26  ;;  %2489 = vmatpush3.bf16.msra.mxu1 %v2454_v1 }
 0x18b   : > { %2505 = vmatpush3.bf16.msra.mxu0 %v2454_v1  ;;  %2491 = vmatprep.subr.bf16.mxu1 %v2458_v16 }
 0x18c   : > { %2507 = vmatprep.subr.bf16.mxu0 %v2458_v16  ;;  %2316 = vmatprep.mubr.msk.f32.mxu1 %vm468_vm2, %v481_v27 }
 0x18d   : > { %2344 = vmatprep.mubr.msk.f32.mxu0 %vm468_vm2, %v2072_v28  ;;  %2317 = vmatmul.mubr.msk.f32.gmra.mrb[4].mxu1 %vm468_vm2, %v482_v29 }
 0x18e   : > { %2345 = vmatmul.mubr.msk.f32.gmra.mrb[12].mxu0 %vm468_vm2, %v2073_v30  ;;  %2493 = vmatpush3.bf16.msra.mxu1 %v2458_v16 }
 0x18f   : > { %2509 = vmatpush3.bf16.msra.mxu0 %v2458_v16  ;;  %2495 = vmatprep.subr.bf16.mxu1 %v2462_v22 }
 0x190   : > { %2511 = vmatprep.subr.bf16.mxu0 %v2462_v22  ;;  %2319 = vmatprep.mubr.msk.f32.mxu1 %vm468_vm2, %v483_v31 }
 0x191   : > { %2347 = vmatprep.mubr.msk.f32.mxu0 %vm468_vm2, %v2074_v32  ;;  %2320 = vmatmul.mubr.msk.f32.gmra.mrb[6].mxu1 %vm468_vm2, %v484_v33 }
 0x192   : > { %2348 = vmatmul.mubr.msk.f32.gmra.mrb[14].mxu0 %vm468_vm2, %v2075_v34  ;;  %2497 = vmatpush3.bf16.msra.mxu1 %v2462_v22 }
 0x193   : > { %2513 = vmatpush3.bf16.msra.mxu0 %v2462_v22  ;;  %2366 = vmatprep.mubr.msk.f32.mxu1 %vm468_vm2, %v2084_v35 }
 0x194   : > { %2394 = vmatprep.mubr.msk.f32.mxu0 %vm468_vm2, %v2100_v36  ;;  %2515 = vmatprep.subr.bf16.mxu0 %v2514_v53 }
 0x195   : > { %2367 = vmatmul.mubr.msk.f32.vlgmr.msra.gmra.mrb[8].mxu1 %vm468_vm2, %v2085_v37  ;;  %2526 = vmatprep.subr.bf16.mxu1 %v2514_v53 }
 0x196   : > { %2395 = vmatmul.mubr.msk.f32.vlgmr.msra.gmra.mrb[16].mxu0 %vm468_vm2, %v2101_v38  ;;  %2369 = vmatprep.mubr.msk.f32.mxu1 %vm468_vm2, %v2086_v39 }
 0x197   : > { %2397 = vmatprep.mubr.msk.f32.mxu0 %vm468_vm2, %v2102_v40  ;;  %2517 = vmatpush3.bf16.msra.mxu0 %v2514_v53 }
 0x198   : > { %2528 = vmatpush3.bf16.msra.mxu1 %v2514_v53  ;;  %2519 = vmatprep.subr.bf16.mxu0 %v2518_v56  ;;  %v239_v53 = vld [vmem:[%s3649_s0 + $0x8] sm:$0xff] }
 0x199   : > { %2370 = vmatmul.mubr.msk.f32.gmra.mrb[10].mxu1 %vm468_vm2, %v2087_v41  ;;  %2527 = vmatprep.subr.bf16.mxu1 %v2518_v56 }
 0x19a   : > { %2398 = vmatmul.mubr.msk.f32.gmra.mrb[18].mxu0 %vm468_vm2, %v2103_v42  ;;  %2372 = vmatprep.mubr.msk.f32.mxu1 %vm468_vm2, %v2088_v43 }
 0x19b   : > { %2400 = vmatprep.mubr.msk.f32.mxu0 %vm468_vm2, %v2104_v44  ;;  %2521 = vmatpush3.bf16.msra.mxu0 %v2518_v56 }
 0x19c   : > { %2529 = vmatpush3.bf16.msra.mxu1 %v2518_v56  ;;  %v242_v56 = vld [vmem:[%s3649_s0 + $0x20] sm:$0xff] }
 0x19d   : > { %2373 = vmatmul.mubr.msk.f32.gmra.mrb[12].mxu1 %vm468_vm2, %v2089_v45  ;;  %2523 = vmatprep.subr.bf16.mxu1 %v3075_v59 }
 0x19e   : > { %2401 = vmatmul.mubr.msk.f32.gmra.mrb[20].mxu0 %vm468_vm2, %v2105_v46  ;;  %2375 = vmatprep.mubr.msk.f32.mxu1 %vm468_vm2, %v2090_v47 }
 0x19f   : > { %2403 = vmatprep.mubr.msk.f32.mxu0 %vm468_vm2, %v2106_v48 }
 0x1a1   : > { %2376 = vmatmul.mubr.msk.f32.gmra.mrb[14].mxu1 %vm468_vm2, %v2091_v49 }
 0x1a2   : > { %2404 = vmatmul.mubr.msk.f32.gmra.mrb[22].mxu0 %vm468_vm2, %v2107_v50 }
 0x258   : > { %v3078_v60 = vpop.f32.mrb[0].mxu1 }
 0x259   : > { %v3080_v61 = vpop.f32.mrb[8].mxu0  ;;  %1398 = vrot.lane.b32.xlu1 %v3078_v60, %s2792_s7  ;;  %v3084_v62 = vpop.f32.mrb[1].mxu1 }
 0x25a   : > { %v1029_v63 = vadd.f32 %v3080_v61, %v3078_v60  ;;  %v3088_v0 = vpop.f32.mrb[9].mxu0  ;;  %1396 = vrot.lane.b32.xlu0 %v3084_v62, %s2792_s7 }
 0x25b   : > { %v1028_v1 = vadd.f32 %v3088_v0, %v3084_v62 }
 0x25c   : > { %v3094_v2 = vpop.f32.mrb[2].mxu1 }
 0x25d   : > { %v3096_v3 = vpop.f32.mrb[10].mxu0  ;;  %1502 = vrot.lane.b32.xlu1 %v3080_v61, %s2792_s7  ;;  %v3100_v4 = vpop.f32.mrb[3].mxu1 }
 0x25e   : > { %v1031_v5 = vadd.f32 %v3096_v3, %v3094_v2  ;;  %v3104_v6 = vpop.f32.mrb[11].mxu0  ;;  %1500 = vrot.lane.b32.xlu0 %v3088_v0, %s2792_s7 }
 0x25f   : > { %v1030_v7 = vadd.f32 %v3104_v6, %v3100_v4 }
 0x260   : > { %v3110_v8 = vpop.f32.mrb[4].mxu1 }
 0x261   : > { %v3112_v9 = vpop.f32.mrb[12].mxu0  ;;  %1402 = vrot.lane.b32.xlu1 %v3094_v2, %s2792_s7  ;;  %v3116_v10 = vpop.f32.mrb[5].mxu1 }
 0x262   : > { %3672 = vst [vmem:[#allocation4_spill] sm:$0xff] %v3116_v10  ;;  %v1033_v15 = vadd.f32 %v3112_v9, %v3110_v8  ;;  %v3120_v16 = vpop.f32.mrb[13].mxu0  ;;  %1400 = vrot.lane.b32.xlu0 %v3100_v4, %s2792_s7 }
 0x263   : > { %3673 = vst [vmem:[#allocation5_spill] sm:$0xff] %v3120_v16  ;;  %v1032_v12 = vadd.f32 %v3120_v16, %v3116_v10 }
 0x264   : > { %v3126_v11 = vpop.f32.mrb[6].mxu1 }
 0x265   : > { %3674 = vst [vmem:[#allocation6_spill] sm:$0xff] %v3126_v11  ;;  %v3128_v17 = vpop.f32.mrb[14].mxu0  ;;  %1506 = vrot.lane.b32.xlu1 %v3096_v3, %s2792_s7  ;;  %v3132_v18 = vpop.f32.mrb[7].mxu1 }
 0x266   : > { %3675 = vst [vmem:[#allocation7_spill] sm:$0xff] %v3128_v17  ;;  %3676 = vst [vmem:[#allocation8_spill] sm:$0xff] %v3132_v18  ;;  %v1035_v19 = vadd.f32 %v3128_v17, %v3126_v11  ;;  %v3136_v20 = vpop.f32.mrb[15].mxu0  ;;  %1504 = vrot.lane.b32.xlu0 %v3104_v6, %s2792_s7 }
 0x267   : > { %3677 = vst [vmem:[#allocation9_spill] sm:$0xff] %v3136_v20  ;;  %v1034_v21 = vadd.f32 %v3136_v20, %v3132_v18 }
 0x268   : > { %v3142_v22 = vpop.f32.mrb[8].mxu1 }
 0x269   : > { %v1037_v13 = vadd.f32 %v3142_v22, %v1029_v63  ;;  %1406 = vrot.lane.b32.xlu1 %v3110_v8, %s2792_s7  ;;  %v3147_v14 = vpop.f32.mrb[9].mxu1  ;;  %v3149_v23 = vpop.f32.mrb[16].mxu0 }
 0x26a   : > { %v1036_v24 = vadd.f32 %v1028_v1, %v3147_v14  ;;  %1404 = vrot.lane.b32.xlu0 %v3116_v10, %s2792_s7  ;;  %v3154_v25 = vpop.f32.mrb[17].mxu0 }
 0x26b   : > { %3678 = vst [vmem:[#allocation10_spill] sm:$0xff] %v3154_v25  ;;  %v1045_v26 = vadd.f32 %v3149_v23, %v1037_v13 }
 0x26c   : > { %v1044_v27 = vadd.f32 %v1036_v24, %v3154_v25  ;;  %v3158_v28 = vpop.f32.mrb[10].mxu1 }
 0x26d   : > { %v1039_v29 = vadd.f32 %v3158_v28, %v1031_v5  ;;  %1510 = vrot.lane.b32.xlu1 %v3112_v9, %s2792_s7  ;;  %v3163_v30 = vpop.f32.mrb[11].mxu1  ;;  %v3165_v31 = vpop.f32.mrb[18].mxu0 }
 0x26e   : > { %3679 = vst [vmem:[#allocation11_spill] sm:$0xff] %v3165_v31  ;;  %v1038_v32 = vadd.f32 %v1030_v7, %v3163_v30  ;;  %1508 = vrot.lane.b32.xlu0 %v3120_v16, %s2792_s7  ;;  %2414 = vmatprep.mubr.msk.f32.mxu0 %vm266_vm1, %v1044_v27  ;;  %v3171_v33 = vpop.f32.mrb[19].mxu0 }
 0x26f   : > { %3680 = vst [vmem:[#allocation12_spill] sm:$0xff] %v3171_v33  ;;  %v1047_v34 = vadd.f32 %v3165_v31, %v1039_v29  ;;  %2415 = vmatmul.mubr.msk.f32.vlgmr.msra.gmra.mrb[24].mxu0 %vm266_vm1, %v1045_v26 }
 0x270   : > { %v1046_v35 = vadd.f32 %v1038_v32, %v3171_v33  ;;  %v3176_v36 = vpop.f32.mrb[12].mxu1 }
 0x271   : > { %v1041_v37 = vadd.f32 %v3176_v36, %v1033_v15  ;;  %1410 = vrot.lane.b32.xlu1 %v3126_v11, %s2792_s7  ;;  %v3181_v38 = vpop.f32.mrb[13].mxu1  ;;  %v3183_v39 = vpop.f32.mrb[20].mxu0 }
 0x272   : > { %3681 = vst [vmem:[#allocation13_spill] sm:$0xff] %v3181_v38  ;;  %3682 = vst [vmem:[#allocation14_spill] sm:$0xff] %v3183_v39  ;;  %v1040_v40 = vadd.f32 %v1032_v12, %v3181_v38  ;;  %1408 = vrot.lane.b32.xlu0 %v3132_v18, %s2792_s7  ;;  %2417 = vmatprep.mubr.msk.f32.mxu0 %vm266_vm1, %v1046_v35  ;;  %v3189_v41 = vpop.f32.mrb[21].mxu0 }
 0x273   : > { %3683 = vst [vmem:[#allocation15_spill] sm:$0xff] %v3189_v41  ;;  %v1049_v42 = vadd.f32 %v3183_v39, %v1041_v37  ;;  %2418 = vmatmul.mubr.msk.f32.gmra.mrb[26].mxu0 %vm266_vm1, %v1047_v34 }
 0x274   : > { %v1048_v43 = vadd.f32 %v1040_v40, %v3189_v41  ;;  %v3194_v44 = vpop.f32.mrb[14].mxu1 }
 0x275   : > { %3684 = vst [vmem:[#allocation16_spill] sm:$0xff] %v3194_v44  ;;  %v1043_v45 = vadd.f32 %v3194_v44, %v1035_v19  ;;  %1514 = vrot.lane.b32.xlu1 %v3128_v17, %s2792_s7  ;;  %v3199_v46 = vpop.f32.mrb[15].mxu1  ;;  %v3201_v47 = vpop.f32.mrb[22].mxu0 }
 0x276   : > { %3685 = vst [vmem:[#allocation17_spill] sm:$0xff] %v3199_v46  ;;  %3686 = vst [vmem:[#allocation18_spill] sm:$0xff] %v3201_v47  ;;  %v1042_v48 = vadd.f32 %v1034_v21, %v3199_v46  ;;  %1512 = vrot.lane.b32.xlu0 %v3136_v20, %s2792_s7  ;;  %2420 = vmatprep.mubr.msk.f32.mxu0 %vm266_vm1, %v1048_v43  ;;  %v3207_v49 = vpop.f32.mrb[23].mxu0 }
 0x277   : > { %3687 = vst [vmem:[#allocation19_spill] sm:$0xff] %v3207_v49  ;;  %v1051_v50 = vadd.f32 %v3201_v47, %v1043_v45  ;;  %2421 = vmatmul.mubr.msk.f32.gmra.mrb[28].mxu0 %vm266_vm1, %v1049_v42 }
 0x278   : > { %v1050_v51 = vadd.f32 %v1042_v48, %v3207_v49 }
 0x279   : > { %1606 = vrot.lane.b32.xlu1 %v3142_v22, %s2792_s7 }
 0x27a   : > { %1604 = vrot.lane.b32.xlu0 %v3147_v14, %s2792_s7  ;;  %2423 = vmatprep.mubr.msk.f32.mxu1 %vm266_vm1, %v1050_v51 }
 0x27b   : > { %2424 = vmatmul.mubr.msk.f32.vlgmr.msra.gmra.mrb[16].mxu1 %vm266_vm1, %v1051_v50 }
 0x27c   : > { %2525 = vmatpush3.bf16.msra.mxu1 %v3075_v59  ;;  %2430 = vmatprep.mubr.msk.f32.mxu1 %vm1187_vm3, %v238_v52  ;;  %v245_v59 = vld [vmem:[%s3649_s0 + $0x38] sm:$0xff] }
 0x27d   : > { %1710 = vrot.lane.b32.xlu1 %v3149_v23, %s2792_s7 }
 0x27e   : > { %1708 = vrot.lane.b32.xlu0 %v3154_v25, %s2792_s7 }
 0x27f   : > { %2431 = vmatmul.mubr.msk.f32.vlgmr.msra.gmra.mrb[18].mxu1 %vm1187_vm3, %v239_v53 }
 0x280   : > { %2433 = vmatprep.mubr.msk.f32.mxu1 %vm1187_vm3, %v240_v54 }
 0x281   : > { %1610 = vrot.lane.b32.xlu1 %v3158_v28, %s2792_s7 }
 0x282   : > { %1608 = vrot.lane.b32.xlu0 %v3163_v30, %s2792_s7 }
 0x283   : > { %2434 = vmatmul.mubr.msk.f32.gmra.mrb[20].mxu1 %vm1187_vm3, %v241_v55 }
 0x284   : > { %2436 = vmatprep.mubr.msk.f32.mxu1 %vm1187_vm3, %v242_v56  ;;  %v3308_v56 = vld [vmem:[%s3654_s5] ss:$0 sm:$0xff] }
 0x285   : > { %1714 = vrot.lane.b32.xlu1 %v3165_v31, %s2792_s7 }
 0x286   : > { %1712 = vrot.lane.b32.xlu0 %v3171_v33, %s2792_s7 }
 0x287   : > { %2437 = vmatmul.mubr.msk.f32.gmra.mrb[22].mxu1 %vm1187_vm3, %v243_v57 }
 0x288   : > { %2439 = vmatprep.mubr.msk.f32.mxu1 %vm1187_vm3, %v244_v58 }
 0x289   : > { %1614 = vrot.lane.b32.xlu1 %v3176_v36, %s2792_s7 }
 0x28a   : > { %1612 = vrot.lane.b32.xlu0 %v3181_v38, %s2792_s7 }
 0x28b   : > { %2440 = vmatmul.mubr.msk.f32.gmra.mrb[16].mxu1 %vm1187_vm3, %v245_v59 }
 0x28d   : > { %1718 = vrot.lane.b32.xlu1 %v3183_v39, %s2792_s7 }
 0x28e   : > { %1716 = vrot.lane.b32.xlu0 %v3189_v41, %s2792_s7 }
 0x291   : > { %1618 = vrot.lane.b32.xlu1 %v3194_v44, %s2792_s7 }
 0x292   : > { %1616 = vrot.lane.b32.xlu0 %v3199_v46, %s2792_s7 }
 0x295   : > { %1722 = vrot.lane.b32.xlu1 %v3201_v47, %s2792_s7 }
 0x296   : > { %1720 = vrot.lane.b32.xlu0 %v3207_v49, %s2792_s7 }
 0x2cb   : > { %v1399_v63 = vpop.permute.xlu1 %1398 }
 0x2cc   : > { %v1397_v1 = vpop.permute.xlu0 %1396 }
 0x2cf   : > { %v1503_v5 = vpop.permute.xlu1 %1502 }
 0x2d0   : > { %v1501_v7 = vpop.permute.xlu0 %1500 }
 0x2d3   : > { %v3279_v15 = vpop.permute.xlu1 %1402 }
 0x2d4   : > { %v3281_v12 = vpop.permute.xlu0 %1400 }
 0x2d7   : > { %v1507_v19 = vpop.permute.xlu1 %1506 }
 0x2d8   : > { %v3283_v21 = vpop.permute.xlu0 %1504 }
 0x2db   : > { %v3285_v13 = vpop.permute.xlu1 %1406 }
 0x2dc   : > { %v3287_v24 = vpop.permute.xlu0 %1404 }
 0x2df   : > { %v3289_v26 = vpop.permute.xlu1 %1510 }
 0x2e0   : > { %v3291_v27 = vpop.permute.xlu0 %1508 }
 0x2e3   : > { %v3293_v29 = vpop.permute.xlu1 %1410 }
 0x2e4   : > { %v3295_v32 = vpop.permute.xlu0 %1408 }
 0x2e7   : > { %v3297_v34 = vpop.permute.xlu1 %1514 }
 0x2e8   : > { %v3299_v35 = vpop.permute.xlu0 %1512 }
 0x2eb   : > { %v1607_v37 = vpop.permute.xlu1 %1606 }
 0x2ec   : > { %v1605_v45 = vpop.permute.xlu0 %1604 }
 0x2ef   : > { %v3301_v50 = vpop.permute.xlu1 %1710 }
 0x2f0   : > { %v3303_v53 = vpop.permute.xlu0 %1708 }
 0x2f3   : > { %v1611_v54 = vpop.permute.xlu1 %1610 }
 0x2f4   : > { %v1609_v57 = vpop.permute.xlu0 %1608 }
 0x2f7   : > { %v3310_v41 = vpop.permute.xlu1 %1714 }
 0x2fb   : > { %v1615_v11 = vpop.permute.xlu1 %1614 }
 0x342   : > { %v2416_v40 = vpop.f32.mrb[24].mxu0 }
 0x343   : > { %v1148_v42 = vpop.f32.mrb[25].mxu0 }
 0x346   : > { %v2419_v43 = vpop.f32.mrb[26].mxu0 }
 0x347   : > { %v1158_v48 = vpop.f32.mrb[27].mxu0 }
 0x34a   : > { %v2422_v51 = vpop.f32.mrb[28].mxu0 }
 0x34b   : > { %v1168_v52 = vpop.f32.mrb[29].mxu0 }
 0x352   : > { %v2432_v55 = vpop.f32.mrb[18].mxu1 }
 0x353   : > { %v1284_v58 = vadd.f32 %v2432_v55, %v2416_v40  ;;  %v1278_v59 = vpop.f32.mrb[19].mxu1 }
 0x354   : > { %v1279_v49 = vadd.f32 %v1278_v59, %v1148_v42 }
 0x355   : > { %v3313_v46 = vadd.f32 %v3308_v56, %v1284_v58  ;;  %v3325_v58 = vpop.permute.xlu0 %1712 }
 0x356   : > { %v3316_v39 = vadd.f32 %v3308_v56, %v1279_v49  ;;  %v2435_v20 = vpop.f32.mrb[20].mxu1 }
 0x357   : > { %2591 = vtanh.f32 %v3313_v46  ;;  %v1421_v18 = vadd.f32 %v1399_v63, %v3313_v46  ;;  %v1525_v47 = vadd.f32 %v1503_v5, %v3313_v46  ;;  %v1629_v44 = vadd.f32 %v1607_v37, %v3313_v46  ;;  %v1288_v40 = vpop.f32.mrb[21].mxu1 }
 0x358   : > { %2593 = vtanh.f32 %v3316_v39  ;;  %v1420_v42 = vadd.f32 %v1397_v1, %v3316_v39  ;;  %v1524_v55 = vadd.f32 %v1501_v7, %v3316_v39  ;;  %v1628_v33 = vadd.f32 %v1605_v45, %v3316_v39 }
 0x359   : > { %v2142_v49 = vmul.f32 -1.442695, %v1421_v18  ;;  %v2150_v59 = vmul.f32 -1.442695, %v1525_v47  ;;  %v2158_v17 = vmul.f32 -1.442695, %v1629_v44  ;;  %v1294_v38 = vadd.f32 %v2435_v20, %v2419_v43  ;;  %v1613_v45 = vpop.permute.xlu0 %1612 }
 0x35a   : > { %v2141_v63 = vmul.f32 -1.442695, %v1420_v42  ;;  %v2438_v5 = vpop.f32.mrb[22].mxu1  ;;  %v2149_v37 = vmul.f32 -1.442695, %v1524_v55  ;;  %v1289_v31 = vadd.f32 %v1288_v40, %v1158_v48 }
 0x35b   : > { %2595 = vpow2.f32 %v2142_v49  ;;  %v1304_v16 = vadd.f32 %v2438_v5, %v2422_v51  ;;  %v1298_v10 = vpop.f32.mrb[23].mxu1  ;;  %v2157_v1 = vmul.f32 -1.442695, %v1628_v33  ;;  %v3329_v7 = vadd.f32 %v3308_v56, %v1294_v38 }
 0x35c   : > { %2597 = vpow2.f32 %v2150_v59  ;;  %v1299_v25 = vadd.f32 %v1298_v10, %v1168_v52  ;;  %v3332_v18 = vadd.f32 %v3308_v56, %v1289_v31 }
 0x35d   : > { %2599 = vpow2.f32 %v2158_v17  ;;  %v3335_v44 = vadd.f32 %v3308_v56, %v1304_v16  ;;  %v1423_v20 = vadd.f32 %v3279_v15, %v3329_v7  ;;  %v1527_v47 = vadd.f32 %v1507_v19, %v3329_v7  ;;  %v3345_v16 = vpop.permute.xlu1 %1718  ;;  %v3361_v59 = vpop.permute.xlu0 %1716 }
 0x35e   : > { %2601 = vpow2.f32 %v2141_v63  ;;  %v1631_v43 = vadd.f32 %v1611_v54, %v3329_v7  ;;  %v2441_v33 = vpop.f32.mrb[16].mxu1  ;;  %v1422_v10 = vadd.f32 %v3281_v12, %v3332_v18  ;;  %v1526_v17 = vadd.f32 %v3283_v21, %v3332_v18 }
 0x35f   : > { %2603 = vpow2.f32 %v2149_v37  ;;  %v1308_v31 = vpop.f32.mrb[17].mxu1  ;;  %v2144_v38 = vmul.f32 -1.442695, %v1423_v20  ;;  %v2152_v48 = vmul.f32 -1.442695, %v1527_v47  ;;  %v1630_v19 = vadd.f32 %v1609_v57, %v3332_v18 }
 0x360   : > { %2605 = vpow2.f32 %v2157_v1  ;;  %v2160_v15 = vmul.f32 -1.442695, %v1631_v43  ;;  %v2143_v54 = vmul.f32 -1.442695, %v1422_v10  ;;  %v1425_v12 = vadd.f32 %v3285_v13, %v3335_v44 }
 0x361   : > { %v2592_v51 = vpop.eup %2591  ;;  %2607 = vtanh.f32 %v3329_v7  ;;  %v2151_v21 = vmul.f32 -1.442695, %v1526_v17  ;;  %v1529_v40 = vadd.f32 %v3289_v26, %v3335_v44  ;;  %v2159_v42 = vmul.f32 -1.442695, %v1630_v19  ;;  %v1619_v63 = vpop.permute.xlu1 %1618 }
 0x362   : > { %v2594_v52 = vpop.eup %2593  ;;  %2609 = vpow2.f32 %v2144_v38  ;;  %1814 = vrot.lane.b32.xlu1 %v2592_v51, %s2792_s7  ;;  %v1633_v55 = vadd.f32 %v1615_v11, %v3335_v44  ;;  %v3357_v57 = vadd.f32 %v3308_v56, %v1299_v25  ;;  %v2146_v26 = vmul.f32 -1.442695, %v1425_v12 }
 0x363   : > { %2611 = vpow2.f32 %v2152_v48  ;;  %1812 = vrot.lane.b32.xlu0 %v2594_v52, %s2792_s7  ;;  %v3369_v37 = vadd.f32 %v2441_v33, %v3308_v56  ;;  %v2154_v25 = vmul.f32 -1.442695, %v1529_v40  ;;  %v1617_v48 = vpop.permute.xlu0 %1616 }
 0x364   : > { %2613 = vpow2.f32 %v2160_v15  ;;  %v1424_v5 = vadd.f32 %v3287_v24, %v3357_v57  ;;  %v1528_v1 = vadd.f32 %v3291_v27, %v3357_v57  ;;  %v2162_v47 = vmul.f32 -1.442695, %v1633_v55 }
 0x365   : > { %v3359_v49 = vpop.eup %2595  ;;  %2615 = vtanh.f32 %v3332_v18  ;;  %v1632_v43 = vadd.f32 %v1613_v45, %v3357_v57  ;;  %v1427_v17 = vadd.f32 %v3293_v29, %v3369_v37  ;;  %v1531_v15 = vadd.f32 %v3297_v34, %v3369_v37  ;;  %v1723_v19 = vpop.permute.xlu1 %1722 }
 0x366   : > { %v3364_v13 = vpop.eup %2597  ;;  %2617 = vpow2.f32 %v2143_v54  ;;  %v2145_v33 = vmul.f32 -1.442695, %v1424_v5  ;;  %v2153_v27 = vmul.f32 -1.442695, %v1528_v1  ;;  %v3388_v45 = vadd.f32 %v3308_v56, %v1308_v31 }
 0x367   : > { %v3371_v11 = vpop.eup %2599  ;;  %2619 = vpow2.f32 %v2151_v21  ;;  %v2161_v52 = vmul.f32 -1.442695, %v1632_v43  ;;  %v1635_v54 = vadd.f32 %v1619_v63, %v3369_v37  ;;  %v1739_v12 = vadd.f32 %v1723_v19, %v3369_v37  ;;  %v1721_v5 = vpop.permute.xlu0 %1720 }
 0x368   : > { %v3375_v20 = vpop.eup %2601  ;;  %2621 = vpow2.f32 %v2159_v42  ;;  %v2148_v34 = vmul.f32 -1.442695, %v1427_v17  ;;  %v2156_v31 = vmul.f32 -1.442695, %v1531_v15  ;;  %v1426_v40 = vadd.f32 %v3295_v32, %v3388_v45 }
 0x369   : > { %v3378_v10 = vpop.eup %2603  ;;  %2623 = vtanh.f32 %v3335_v44  ;;  %v2164_v55 = vmul.f32 -1.442695, %v1635_v54  ;;  %v1530_v63 = vadd.f32 %v3299_v35, %v3388_v45  ;;  %v1634_v1 = vadd.f32 %v1617_v48, %v3388_v45 }
 0x36a   : > { %v3381_v24 = vpop.eup %2605  ;;  %2625 = vpow2.f32 %v2146_v26  ;;  %v1738_v32 = vadd.f32 %v1721_v5, %v3388_v45  ;;  %v1733_v48 = vadd.f32 %v3301_v50, %v3313_v46  ;;  %v1453_v54 = vadd.f32 1.0, %v3359_v49 }
 0x36b   : > { %v2608_v38 = vpop.eup %2607  ;;  %2627 = vpow2.f32 %v2154_v25  ;;  %v2172_v25 = vmul.f32 -1.442695, %v1739_v12  ;;  %v2155_v35 = vmul.f32 -1.442695, %v1530_v63  ;;  %v1452_v63 = vadd.f32 1.0, %v3375_v20 }
 0x36c   : > { %v3390_v51 = vpop.eup %2609  ;;  %2629 = vpow2.f32 %v2162_v47  ;;  %1818 = vrot.lane.b32.xlu1 %v2608_v38, %s2792_s7  ;;  %v2171_v19 = vmul.f32 -1.442695, %v1738_v32 }
 0x36d   : > { %v3394_v29 = vpop.eup %2611  ;;  %2631 = vtanh.f32 %v3357_v57 }
 0x36e   : > { %v3398_v21 = vpop.eup %2613  ;;  %2633 = vpow2.f32 %v2145_v33  ;;  %v2147_v33 = vmul.f32 -1.442695, %v1426_v40  ;;  %v1732_v40 = vadd.f32 %v3303_v53, %v3316_v39  ;;  %v1735_v53 = vadd.f32 %v3310_v41, %v3329_v7 }
 0x36f   : > { %v2616_v56 = vpop.eup %2615  ;;  %2635 = vpow2.f32 %v2153_v27  ;;  %v2163_v27 = vmul.f32 -1.442695, %v1634_v1  ;;  %v1734_v41 = vadd.f32 %v3325_v58, %v3332_v18 }
 0x370   : > { %v3402_v42 = vpop.eup %2617  ;;  %2637 = vpow2.f32 %v2161_v52  ;;  %1816 = vrot.lane.b32.xlu0 %v2616_v56, %s2792_s7  ;;  %v2165_v32 = vmul.f32 -1.442695, %v1732_v40 }
 0x371   : > { %v3407_v26 = vpop.eup %2619  ;;  %2639 = vtanh.f32 %v3369_v37  ;;  %v2167_v58 = vmul.f32 -1.442695, %v1734_v41 }
 0x372   : > { %v3411_v47 = vpop.eup %2621  ;;  %2641 = vpow2.f32 %v2148_v34  ;;  %v1557_v34 = vadd.f32 1.0, %v3364_v13  ;;  %v1556_v13 = vadd.f32 1.0, %v3378_v10  ;;  %v1559_v10 = vadd.f32 1.0, %v3394_v29 }
 0x373   : > { %v2624_v43 = vpop.eup %2623  ;;  %2643 = vpow2.f32 %v2156_v31  ;;  %v1661_v31 = vadd.f32 1.0, %v3371_v11  ;;  %v1660_v11 = vadd.f32 1.0, %v3381_v24  ;;  %v1663_v24 = vadd.f32 1.0, %v3398_v21 }
 0x374   : > { %v3414_v17 = vpop.eup %2625  ;;  %2645 = vpow2.f32 %v2164_v55  ;;  %1822 = vrot.lane.b32.xlu1 %v2624_v43, %s2792_s7  ;;  %v2166_v55 = vmul.f32 -1.442695, %v1733_v48  ;;  %v1455_v43 = vadd.f32 1.0, %v3390_v51  ;;  %v2168_v48 = vmul.f32 -1.442695, %v1735_v53 }
 0x375   : > { %v3417_v38 = vpop.eup %2627  ;;  %2647 = vpow2.f32 %v2172_v25  ;;  %v1454_v51 = vadd.f32 1.0, %v3402_v42  ;;  %v1662_v21 = vadd.f32 1.0, %v3411_v47  ;;  %v1737_v42 = vadd.f32 %v3345_v16, %v3335_v44 }
 0x376   : > { %v3419_v15 = vpop.eup %2629  ;;  %2649 = vtanh.f32 %v3388_v45 }
 0x377   : > { %v2632_v52 = vpop.eup %2631  ;;  %2651 = vpow2.f32 %v2147_v33 }
 0x378   : > { %v3425_v12 = vpop.eup %2633  ;;  %2653 = vpow2.f32 %v2155_v35  ;;  %1820 = vrot.lane.b32.xlu0 %v2632_v52, %s2792_s7  ;;  %v1558_v52 = vadd.f32 1.0, %v3407_v26  ;;  %v1457_v26 = vadd.f32 1.0, %v3414_v17  ;;  %v1736_v17 = vadd.f32 %v3361_v59, %v3357_v57 }
 0x379   : > { %v3429_v56 = vpop.eup %2635  ;;  %2655 = vpow2.f32 %v2163_v27 }
 0x37a   : > { %v3432_v50 = vpop.eup %2637  ;;  %2657 = vpow2.f32 %v2171_v19 }
 0x37b   : > { %v2640_v49 = vpop.eup %2639  ;;  %2659 = vrcp.f32 %v1453_v54 }
 0x37c   : > { %v3437_v5 = vpop.eup %2641  ;;  %1826 = vrot.lane.b32.xlu1 %v2640_v49, %s2792_s7  ;;  %2661 = vrcp.f32 %v1557_v34 }
 0x37d   : > { %v3441_v25 = vpop.eup %2643  ;;  %2663 = vrcp.f32 %v1661_v31 }
 0x37e   : > { %v3444_v1 = vpop.eup %2645  ;;  %2665 = vpow2.f32 %v2166_v55 }
 0x37f   : > { %v3448_v20 = vpop.eup %2647  ;;  %2667 = vrcp.f32 %v1452_v63 }
 0x380   : > { %v2650_v33 = vpop.eup %2649  ;;  %2669 = vrcp.f32 %v1556_v13 }
 0x381   : > { %v3452_v35 = vpop.eup %2651  ;;  %1824 = vrot.lane.b32.xlu0 %v2650_v33, %s2792_s7  ;;  %2671 = vrcp.f32 %v1660_v11 }
 0x382   : > { %v3456_v27 = vpop.eup %2653  ;;  %2673 = vpow2.f32 %v2165_v32 }
 0x383   : > { %v3460_v19 = vpop.eup %2655  ;;  %2675 = vrcp.f32 %v1455_v43 }
 0x384   : > { %v3463_v29 = vpop.eup %2657  ;;  %2677 = vrcp.f32 %v1559_v10 }
 0x385   : > { %v2660_v54 = vpop.eup %2659  ;;  %2679 = vrcp.f32 %v1663_v24  ;;  %v2170_v24 = vmul.f32 -1.442695, %v1737_v42 }
 0x386   : > { %v2662_v34 = vpop.eup %2661  ;;  %v1477_v31 = vmul.f32 %v2660_v54, %v3078_v60  ;;  %2681 = vpow2.f32 %v2168_v48  ;;  %v1561_v60 = vadd.f32 1.0, %v3417_v38 }
 0x387   : > { %v2664_v40 = vpop.eup %2663  ;;  %v1581_v55 = vmul.f32 %v2662_v34, %v3080_v61  ;;  %2683 = vrcp.f32 %v1454_v51  ;;  %v1665_v61 = vadd.f32 1.0, %v3419_v15  ;;  %v1664_v34 = vadd.f32 1.0, %v3432_v50 }
 0x388   : > { %v2666_v49 = vpop.eup %2665  ;;  %v1685_v63 = vmul.f32 %v2664_v40, %v3142_v22  ;;  %2685 = vrcp.f32 %v1558_v52  ;;  %v2169_v40 = vmul.f32 -1.442695, %v1736_v17  ;;  %v1563_v50 = vadd.f32 1.0, %v3441_v25 }
 0x389   : > { %v2668_v13 = vpop.eup %2667  ;;  %v1589_v47 = vadd.f32 %v1581_v55, %v1477_v31  ;;  %v1765_v11 = vadd.f32 1.0, %v2666_v49  ;;  %2687 = vrcp.f32 %v1662_v21 }
 0x38a   : > { %v2670_v53 = vpop.eup %2669  ;;  %v1476_v32 = vmul.f32 %v2668_v13, %v3084_v62  ;;  %2689 = vpow2.f32 %v2167_v58  ;;  %v1456_v62 = vadd.f32 1.0, %v3425_v12 }
 0x38b   : > { %v2672_v43 = vpop.eup %2671  ;;  %v1693_v33 = vadd.f32 %v1685_v63, %v1589_v47  ;;  %2691 = vrcp.f32 %v1765_v11  ;;  %v1580_v22 = vmul.f32 %v2670_v53, %v3088_v0  ;;  %v1560_v0 = vadd.f32 1.0, %v3429_v56 }
 0x38c   : > { %v2674_v16 = vpop.eup %2673  ;;  %v1684_v10 = vmul.f32 %v2672_v43, %v3147_v14  ;;  %2693 = vrcp.f32 %v1457_v26  ;;  %v1459_v56 = vadd.f32 1.0, %v3437_v5 }
 0x38d   : > { %v2676_v38 = vpop.eup %2675  ;;  %v1588_v41 = vadd.f32 %v1580_v22, %v1476_v32  ;;  %v1764_v48 = vadd.f32 1.0, %v2674_v16  ;;  %2695 = vrcp.f32 %v1561_v60  ;;  %v1771_v60 = vadd.f32 1.0, %v3448_v20  ;;  %v3688_v20 = vld [vmem:[#allocation10_spill] sm:$0xff] }
 0x38e   : > { %v2678_v15 = vpop.eup %2677  ;;  %v1479_v51 = vmul.f32 %v2676_v38, %v3094_v2  ;;  %2697 = vrcp.f32 %v1665_v61  ;;  %v1458_v32 = vadd.f32 1.0, %v3452_v35 }
 0x38f   : > { %v2680_v52 = vpop.eup %2679  ;;  %v1692_v54 = vadd.f32 %v1684_v10, %v1588_v41  ;;  %2699 = vrcp.f32 %v1764_v48  ;;  %v1583_v59 = vmul.f32 %v2678_v15, %v3096_v3  ;;  %v3689_v41 = vld [vmem:[#allocation4_spill] sm:$0xff] }
 0x390   : > { %v2682_v14 = vpop.eup %2681  ;;  %v1687_v21 = vmul.f32 %v2680_v52, %v3158_v28  ;;  %2701 = vpow2.f32 %v2170_v24 }
 0x391   : > { %v2684_v31 = vpop.eup %2683  ;;  %v1591_v58 = vadd.f32 %v1583_v59, %v1479_v51  ;;  %v1767_v12 = vadd.f32 1.0, %v2682_v14  ;;  %2703 = vrcp.f32 %v1456_v62  ;;  %v3690_v62 = vld [vmem:[#allocation5_spill] sm:$0xff] }
 0x392   : > { %v2686_v2 = vpop.eup %2685  ;;  %v1478_v55 = vmul.f32 %v2684_v31, %v3100_v4  ;;  %2705 = vrcp.f32 %v1560_v0  ;;  %v1667_v4 = vadd.f32 1.0, %v3444_v1  ;;  %v1562_v1 = vadd.f32 1.0, %v3456_v27  ;;  %v3691_v0 = vld [vmem:[#allocation11_spill] sm:$0xff]  ;;  %v3692_v14 = vld [vmem:[#allocation13_spill] sm:$0xff] }
 0x393   : > { %v2688_v49 = vpop.eup %2687  ;;  %v1695_v42 = vadd.f32 %v1687_v21, %v1591_v58  ;;  %2707 = vrcp.f32 %v1767_v12  ;;  %v1582_v3 = vmul.f32 %v2686_v2, %v3104_v6  ;;  %v3693_v12 = vld [vmem:[#allocation6_spill] sm:$0xff] }
 0x394   : > { %v2690_v28 = vpop.eup %2689  ;;  %v1686_v63 = vmul.f32 %v2688_v49, %v3163_v30  ;;  %2709 = vrcp.f32 %v1664_v34 }
 0x395   : > { %v2692_v26 = vpop.eup %2691  ;;  %v1590_v13 = vadd.f32 %v1582_v3, %v1478_v55  ;;  %v1766_v47 = vadd.f32 1.0, %v2690_v28  ;;  %2711 = vpow2.f32 %v2169_v40  ;;  %v3694_v55 = vld [vmem:[#allocation12_spill] sm:$0xff]  ;;  %v3695_v3 = vld [vmem:[#allocation7_spill] sm:$0xff] }
 0x396   : > { %v2694_v11 = vpop.eup %2693  ;;  %v1789_v5 = vmul.f32 %v2692_v26, %v3149_v23  ;;  %2713 = vrcp.f32 %v1459_v56  ;;  %v3696_v26 = vld [vmem:[#allocation16_spill] sm:$0xff] }
 0x397   : > { %v2696_v53 = vpop.eup %2695  ;;  %v1694_v6 = vadd.f32 %v1686_v63, %v1590_v13  ;;  %2715 = vrcp.f32 %v1766_v47  ;;  %v1481_v30 = vmul.f32 %v2694_v11, %v3110_v8  ;;  %v1666_v8 = vadd.f32 1.0, %v3460_v19 }
 0x398   : > { %v2698_v25 = vpop.eup %2697  ;;  %v1797_v61 = vadd.f32 %v1789_v5, %v1693_v33  ;;  %v1585_v43 = vmul.f32 %v2696_v53, %v3112_v9  ;;  %2717 = vrcp.f32 %v1563_v50  ;;  %v1770_v9 = vadd.f32 1.0, %v3463_v29 }
 0x399   : > { %v2700_v22 = vpop.eup %2699  ;;  %v1689_v23 = vmul.f32 %v2698_v25, %v3176_v36  ;;  %2719 = vrcp.f32 %v1667_v4  ;;  %v3697_v4 = vld [vmem:[#allocation18_spill] sm:$0xff]  ;;  %v3699_v25 = vld [vmem:[#allocation9_spill] sm:$0xff] }
 0x39a   : > { %v2702_v16 = vpop.eup %2701  ;;  %1854 = vrot.lane.b32.xlu1 %v1797_v61, %s2793_s8  ;;  %v1788_v17 = vmul.f32 %v2700_v22, %v3688_v20  ;;  %v1593_v10 = vadd.f32 %v1585_v43, %v1481_v30  ;;  %2721 = vrcp.f32 %v1771_v60  ;;  %v3698_v60 = vld [vmem:[#allocation8_spill] sm:$0xff]  ;;  %v3701_v20 = vld [vmem:[#allocation17_spill] sm:$0xff] }
 0x39b   : > { %v2704_v35 = vpop.eup %2703  ;;  %v1769_v33 = vadd.f32 1.0, %v2702_v16  ;;  %2723 = vrcp.f32 %v1458_v32 }
 0x39c   : > { %v2706_v24 = vpop.eup %2705  ;;  %v1796_v27 = vadd.f32 %v1788_v17, %v1692_v54  ;;  %v1697_v38 = vadd.f32 %v1689_v23, %v1593_v10  ;;  %v1480_v36 = vmul.f32 %v2704_v35, %v3689_v41  ;;  %2725 = vrcp.f32 %v1562_v1  ;;  %v3700_v1 = vld [vmem:[#allocation14_spill] sm:$0xff] }
 0x39d   : > { %v2708_v48 = vpop.eup %2707  ;;  %2727 = vrcp.f32 %v1769_v33  ;;  %v1584_v15 = vmul.f32 %v2706_v24, %v3690_v62  ;;  %v3703_v24 = vld [vmem:[#allocation15_spill] sm:$0xff]  ;;  %v2136_v62 = vmul.f32 -1.442695, %v3329_v7  ;;  %v2140_v7 = vmul.f32 -1.442695, %v3369_v37 }
 0x39e   : > { %v2710_v51 = vpop.eup %2709  ;;  %1852 = vrot.lane.b32.xlu0 %v1796_v27, %s2793_s8  ;;  %v1791_v19 = vmul.f32 %v2708_v48, %v3691_v0  ;;  %2729 = vrcp.f32 %v1666_v8  ;;  %v3702_v8 = vld [vmem:[#allocation19_spill] sm:$0xff]  ;;  %v2134_v48 = vmul.f32 -1.442695, %v3313_v46  ;;  %v2137_v46 = vmul.f32 -1.442695, %v3357_v57 }
 0x39f   : > { %v2712_v52 = vpop.eup %2711  ;;  %v1592_v59 = vadd.f32 %v1584_v15, %v1480_v36  ;;  %v1688_v29 = vmul.f32 %v2710_v51, %v3692_v14  ;;  %2731 = vrcp.f32 %v1770_v9  ;;  %v2135_v51 = vmul.f32 -1.442695, %v3332_v18 }
 0x3a0   : > { %v2714_v54 = vpop.eup %2713  ;;  %v1799_v21 = vadd.f32 %v1791_v19, %v1695_v42  ;;  %v1768_v34 = vadd.f32 1.0, %v2712_v52 }
 0x3a1   : > { %v2716_v31 = vpop.eup %2715  ;;  %v1696_v58 = vadd.f32 %v1688_v29, %v1592_v59  ;;  %v1483_v40 = vmul.f32 %v2714_v54, %v3693_v12  ;;  %v2138_v29 = vmul.f32 -1.442695, %v3335_v44 }
 0x3a2   : > { %v2718_v2 = vpop.eup %2717  ;;  %1858 = vrot.lane.b32.xlu1 %v1799_v21, %s2793_s8  ;;  %v1790_v56 = vmul.f32 %v2716_v31, %v3694_v55  ;;  %2733 = vrcp.f32 %v1768_v34 }
 0x3a3   : > { %v2720_v49 = vpop.eup %2719  ;;  %v1587_v28 = vmul.f32 %v2718_v2, %v3695_v3  ;;  %2735 = vpow2.f32 %v2134_v48 }
 0x3a4   : > { %v2722_v63 = vpop.eup %2721  ;;  %v1798_v50 = vadd.f32 %v1790_v56, %v1694_v6  ;;  %v1691_v13 = vmul.f32 %v2720_v49, %v3696_v26 }
 0x3a5   : > { %v2724_v47 = vpop.eup %2723  ;;  %v1595_v42 = vadd.f32 %v1587_v28, %v1483_v40  ;;  %v1795_v11 = vmul.f32 %v2722_v63, %v3697_v4 }
 0x3a6   : > { %v2726_v5 = vpop.eup %2725  ;;  %1856 = vrot.lane.b32.xlu0 %v1798_v50, %s2793_s8  ;;  %v1482_v53 = vmul.f32 %v2724_v47, %v3698_v60 }
 0x3a7   : > { %v2728_v30 = vpop.eup %2727  ;;  %v1699_v32 = vadd.f32 %v1691_v13, %v1595_v42  ;;  %v1586_v61 = vmul.f32 %v2726_v5, %v3699_v25 }
 0x3a8   : > { %v2730_v43 = vpop.eup %2729  ;;  %v1793_v22 = vmul.f32 %v2728_v30, %v3700_v1 }
 0x3a9   : > { %v2732_v23 = vpop.eup %2731  ;;  %v1803_v6 = vadd.f32 %v1795_v11, %v1699_v32  ;;  %v1594_v16 = vadd.f32 %v1586_v61, %v1482_v53  ;;  %v1690_v17 = vmul.f32 %v2730_v43, %v3701_v20 }
 0x3aa   : > { %v1801_v10 = vadd.f32 %v1793_v22, %v1697_v38  ;;  %v1794_v35 = vmul.f32 %v2732_v23, %v3702_v8  ;;  %v2133_v38 = vmul.f32 -1.442695, %v3316_v39 }
 0x3ab   : > { %v1698_v33 = vadd.f32 %v1690_v17, %v1594_v16 }
 0x3ac   : > { %v2734_v9 = vpop.eup %2733  ;;  %1862 = vrot.lane.b32.xlu1 %v1801_v10, %s2793_s8  ;;  %2737 = vpow2.f32 %v2133_v38 }
 0x3ad   : > { %v1792_v27 = vmul.f32 %v2734_v9, %v3703_v24  ;;  %v1802_v41 = vadd.f32 %v1794_v35, %v1698_v33  ;;  %2739 = vpow2.f32 %v2136_v62  ;;  %v2736_v0 = vpop.eup %2735 }
 0x3ae   : > { %2741 = vpow2.f32 %v2135_v51  ;;  %v1357_v52 = vadd.f32 1.0, %v2736_v0 }
 0x3af   : > { %v1800_v36 = vadd.f32 %v1792_v27, %v1696_v58  ;;  %v2139_v58 = vmul.f32 -1.442695, %v3388_v45 }
 0x3b0   : > { %1866 = vrot.lane.b32.xlu1 %v1803_v6, %s2793_s8  ;;  %2743 = vrcp.f32 %v1357_v52 }
 0x3b1   : > { %1860 = vrot.lane.b32.xlu0 %v1800_v36, %s2793_s8  ;;  %2745 = vpow2.f32 %v2138_v29 }
 0x3b2   : > { %2747 = vpow2.f32 %v2137_v46 }
 0x3b5   : > { %1864 = vrot.lane.b32.xlu0 %v1802_v41, %s2793_s8  ;;  %s2794_s8 = smov 96  }
 0x3b6   : > { %v2738_v14 = vpop.eup %2737 }
 0x3b7   : > { %v1356_v54 = vadd.f32 1.0, %v2738_v14  ;;  %v2740_v21 = vpop.eup %2739 }
 0x3b8   : > { %v1359_v18 = vadd.f32 1.0, %v2740_v21  ;;  %v2742_v31 = vpop.eup %2741 }
 0x3b9   : > { %2749 = vrcp.f32 %v1356_v54  ;;  %v1358_v44 = vadd.f32 1.0, %v2742_v31 }
 0x3ba   : > { %2751 = vpow2.f32 %v2140_v7  ;;  %v3533_v57 = vpop.eup %2743 }
 0x3bb   : > { %2753 = vrcp.f32 %v1359_v18  ;;  %v2746_v2 = vpop.eup %2745 }
 0x3bc   : > { %2755 = vpow2.f32 %v2139_v58  ;;  %v2748_v49 = vpop.eup %2747  ;;  %v1361_v63 = vadd.f32 1.0, %v2746_v2 }
 0x3bd   : > { %2757 = vrcp.f32 %v1358_v44  ;;  %v1360_v13 = vadd.f32 1.0, %v2748_v49 }
 0x3c3   : > { %v3538_v28 = vpop.eup %2749 }
 0x3c4   : > { %v2752_v45 = vpop.eup %2751 }
 0x3c5   : > { %v3546_v42 = vpop.eup %2753  ;;  %v1363_v4 = vadd.f32 1.0, %v2752_v45 }
 0x3c6   : > { %v2756_v11 = vpop.eup %2755 }
 0x3c7   : > { %v2758_v30 = vpop.eup %2757  ;;  %v1362_v32 = vadd.f32 1.0, %v2756_v11 }
 0x3d4   : > { %v1815_v15 = vpop.permute.xlu1 %1814 }
 0x3d5   : > { %v1813_v19 = vpop.permute.xlu0 %1812  ;;  %v1837_v55 = vmul.f32 %v3533_v57, %v1815_v15 }
 0x3d6   : > { %v1836_v50 = vmul.f32 %v3538_v28, %v1813_v19 }
 0x3de   : > { %v1819_v59 = vpop.permute.xlu1 %1818 }
 0x3df   : > { %v1839_v5 = vmul.f32 %v3546_v42, %v1819_v59 }
 0x3e2   : > { %v1817_v39 = vpop.permute.xlu0 %1816 }
 0x3e3   : > { %v1838_v25 = vmul.f32 %v2758_v30, %v1817_v39 }
 0x3e6   : > { %v1823_v34 = vpop.permute.xlu1 %1822 }
 0x3ea   : > { %v1821_v12 = vpop.permute.xlu0 %1820 }
 0x3ee   : > { %v1827_v40 = vpop.permute.xlu1 %1826 }
 0x3f3   : > { %v1825_v37 = vpop.permute.xlu0 %1824 }
 0x40c   : > { %v1855_v56 = vpop.permute.xlu1 %1854 }
 0x40d   : > { %v3536_v3 = vadd.f32 %v1855_v56, %v1837_v55 }
 0x40f   : > { %2759 = vtanh.f32 %v3536_v3  ;;  %1973 = vst.msk [vmem:[#allocation3 + $0x8] sm:$0xff] %vm266_vm1, %v3536_v3 }
 0x410   : > { %v1853_v26 = vpop.permute.xlu0 %1852  ;;  %2761 = vrcp.f32 %v1361_v63 }
 0x411   : > { %v3544_v47 = vadd.f32 %v1853_v26, %v1836_v50 }
 0x413   : > { %2763 = vtanh.f32 %v3544_v47  ;;  %1972 = vst.msk [vmem:[#allocation3] sm:$0xff] %vm266_vm1, %v3544_v47 }
 0x414   : > { %v1859_v60 = vpop.permute.xlu1 %1858  ;;  %2765 = vrcp.f32 %v1360_v13 }
 0x415   : > { %v3552_v53 = vadd.f32 %v1859_v60, %v1839_v5  ;;  %2767 = vrcp.f32 %v1363_v4 }
 0x417   : > { %2769 = vtanh.f32 %v3552_v53  ;;  %1975 = vst.msk [vmem:[#allocation3 + $0x18] sm:$0xff] %vm266_vm1, %v3552_v53 }
 0x418   : > { %v1857_v61 = vpop.permute.xlu0 %1856  ;;  %2771 = vrcp.f32 %v1362_v32 }
 0x419   : > { %v2760_v43 = vpop.eup %2759  ;;  %v3557_v1 = vadd.f32 %v1857_v61, %v1838_v25 }
 0x41a   : > { %1902 = vrot.lane.b32.xlu1 %v2760_v43, %s2792_s7  ;;  %v2762_v22 = vpop.eup %2761 }
 0x41b   : > { %2773 = vtanh.f32 %v3557_v1  ;;  %1974 = vst.msk [vmem:[#allocation3 + $0x10] sm:$0xff] %vm266_vm1, %v3557_v1  ;;  %v1841_v6 = vmul.f32 %v2762_v22, %v1823_v34 }
 0x41d   : > { %v2764_v23 = vpop.eup %2763 }
 0x41e   : > { %v1863_v16 = vpop.permute.xlu1 %1862  ;;  %1900 = vrot.lane.b32.xlu0 %v2764_v23, %s2792_s7  ;;  %v2766_v20 = vpop.eup %2765 }
 0x41f   : > { %v3564_v17 = vadd.f32 %v1863_v16, %v1841_v6  ;;  %v2768_v10 = vpop.eup %2767  ;;  %v1840_v33 = vmul.f32 %v2766_v20, %v1821_v12 }
 0x420   : > { %v1843_v35 = vmul.f32 %v2768_v10, %v1827_v40 }
 0x421   : > { %v2770_v8 = vpop.eup %2769  ;;  %2775 = vtanh.f32 %v3564_v17  ;;  %1977 = vst.msk [vmem:[#allocation3 + $0x28] sm:$0xff] %vm266_vm1, %v3564_v17 }
 0x422   : > { %v1867_v9 = vpop.permute.xlu1 %1866  ;;  %1906 = vrot.lane.b32.xlu1 %v2770_v8, %s2792_s7  ;;  %v2772_v41 = vpop.eup %2771 }
 0x423   : > { %v1861_v24 = vpop.permute.xlu0 %1860  ;;  %v3570_v27 = vadd.f32 %v1867_v9, %v1843_v35  ;;  %v1842_v38 = vmul.f32 %v2772_v41, %v1825_v37 }
 0x424   : > { %v3572_v36 = vadd.f32 %v1861_v24, %v1840_v33 }
 0x425   : > { %v2774_v48 = vpop.eup %2773  ;;  %2777 = vtanh.f32 %v3570_v27  ;;  %1979 = vst.msk [vmem:[#allocation3 + $0x38] sm:$0xff] %vm266_vm1, %v3570_v27 }
 0x426   : > { %2779 = vtanh.f32 %v3572_v36  ;;  %1976 = vst.msk [vmem:[#allocation3 + $0x20] sm:$0xff] %vm266_vm1, %v3572_v36  ;;  %1904 = vrot.lane.b32.xlu0 %v2774_v48, %s2792_s7 }
 0x427   : > { %v1865_v62 = vpop.permute.xlu0 %1864 }
 0x428   : > { %v1882_v15 = vadd.f32 %v1865_v62, %v1842_v38 }
 0x42a   : > { %2781 = vtanh.f32 %v1882_v15  ;;  %1978 = vst.msk [vmem:[#allocation3 + $0x30] sm:$0xff] %vm266_vm1, %v1882_v15 }
 0x42b   : > { %v2776_v51 = vpop.eup %2775 }
 0x42c   : > { %1910 = vrot.lane.b32.xlu1 %v2776_v51, %s2792_s7 }
 0x42f   : > { %v2778_v0 = vpop.eup %2777 }
 0x430   : > { %v2780_v19 = vpop.eup %2779  ;;  %1914 = vrot.lane.b32.xlu1 %v2778_v0, %s2792_s7 }
 0x431   : > { %1908 = vrot.lane.b32.xlu0 %v2780_v19, %s2792_s7 }
 0x434   : > { %v2782_v52 = vpop.eup %2781 }
 0x435   : > { %1912 = vrot.lane.b32.xlu0 %v2782_v52, %s2792_s7  ;;  %s2795_s7 = smov (!%p2173_p4), 32  }
 0x48c   : > { %v1903_v59 = vpop.permute.xlu1 %1902 }
 0x48d   : > { %v1925_v14 = vmul.f32 %v3533_v57, %v1903_v59 }
 0x48f   : > { %1942 = vrot.lane.b32.xlu1 %v1925_v14, %s2794_s8 }
 0x490   : > { %v1901_v29 = vpop.permute.xlu0 %1900 }
 0x491   : > { %v1924_v46 = vmul.f32 %v3538_v28, %v1901_v29 }
 0x493   : > { %1940 = vrot.lane.b32.xlu0 %v1924_v46, %s2794_s8 }
 0x494   : > { %v1907_v54 = vpop.permute.xlu1 %1906 }
 0x495   : > { %v1927_v39 = vmul.f32 %v3546_v42, %v1907_v54 }
 0x497   : > { %1946 = vrot.lane.b32.xlu1 %v1927_v39, %s2794_s8 }
 0x498   : > { %v1905_v21 = vpop.permute.xlu0 %1904 }
 0x499   : > { %v1926_v7 = vmul.f32 %v2758_v30, %v1905_v21 }
 0x49b   : > { %1944 = vrot.lane.b32.xlu0 %v1926_v7, %s2794_s8 }
 0x49e   : > { %v1911_v34 = vpop.permute.xlu1 %1910 }
 0x49f   : > { %v1929_v18 = vmul.f32 %v2762_v22, %v1911_v34 }
 0x4a1   : > { %1950 = vrot.lane.b32.xlu1 %v1929_v18, %s2794_s8 }
 0x4a2   : > { %v1915_v31 = vpop.permute.xlu1 %1914 }
 0x4a3   : > { %v1909_v58 = vpop.permute.xlu0 %1908  ;;  %v1931_v12 = vmul.f32 %v2768_v10, %v1915_v31 }
 0x4a4   : > { %v1928_v44 = vmul.f32 %v2766_v20, %v1909_v58 }
 0x4a5   : > { %1954 = vrot.lane.b32.xlu1 %v1931_v12, %s2794_s8 }
 0x4a6   : > { %1948 = vrot.lane.b32.xlu0 %v1928_v44, %s2794_s8 }
 0x4a7   : > { %v1913_v40 = vpop.permute.xlu0 %1912 }
 0x4a8   : > { %v1930_v57 = vmul.f32 %v2772_v41, %v1913_v40 }
 0x4a9   : > { %1996 = vrot.lane.b32.xlu1 (!%p2173_p4), %v3557_v1, %s2795_s7 }
 0x4aa   : > { %1952 = vrot.lane.b32.xlu0 %v1930_v57, %s2794_s8 }
 0x4ad   : > { %1998 = vrot.lane.b32.xlu1 (!%p2173_p4), %v3552_v53, %s2795_s7 }
 0x4ae   : > { %1992 = vrot.lane.b32.xlu0 (!%p2173_p4), %v3544_v47, %s2795_s7 }
 0x4b1   : > { %2002 = vrot.lane.b32.xlu1 (!%p2173_p4), %v3564_v17, %s2795_s7 }
 0x4b2   : > { %1994 = vrot.lane.b32.xlu0 (!%p2173_p4), %v3536_v3, %s2795_s7 }
 0x4b5   : > { %2006 = vrot.lane.b32.xlu1 (!%p2173_p4), %v3570_v27, %s2795_s7 }
 0x4b6   : > { %2000 = vrot.lane.b32.xlu0 (!%p2173_p4), %v3572_v36, %s2795_s7 }
 0x4ba   : > { %2004 = vrot.lane.b32.xlu0 (!%p2173_p4), %v1882_v15, %s2795_s7 }
 0x501   : > { %v1943_v2 = vpop.permute.xlu1 %1942 }
 0x502   : > { %1965 = vst.msk [vmem:[#allocation2 + $0x8] sm:$0xff] %vm266_vm1, %v1943_v2 }
 0x505   : > { %v1941_v55 = vpop.permute.xlu0 %1940 }
 0x506   : > { %1964 = vst.msk [vmem:[#allocation2] sm:$0xff] %vm266_vm1, %v1941_v55 }
 0x509   : > { %v1947_v37 = vpop.permute.xlu1 %1946 }
 0x50a   : > { %1967 = vst.msk [vmem:[#allocation2 + $0x18] sm:$0xff] %vm266_vm1, %v1947_v37 }
 0x50d   : > { %v1945_v56 = vpop.permute.xlu0 %1944 }
 0x50e   : > { %1966 = vst.msk [vmem:[#allocation2 + $0x10] sm:$0xff] %vm266_vm1, %v1945_v56 }
 0x513   : > { %v1951_v49 = vpop.permute.xlu1 %1950 }
 0x514   : > { %1969 = vst.msk [vmem:[#allocation2 + $0x28] sm:$0xff] %vm266_vm1, %v1951_v49 }
 0x517   : > { %v1955_v28 = vpop.permute.xlu1 %1954  ;;  %1983 = sbr.rel (%p2173_p4) target bundleno = 1327 (0x52f), region = 52 }
 0x518   : > { %v1949_v63 = vpop.permute.xlu0 %1948  ;;  %1971 = vst.msk [vmem:[#allocation2 + $0x38] sm:$0xff] %vm266_vm1, %v1955_v28 }
 0x519   : > { %1968 = vst.msk [vmem:[#allocation2 + $0x20] sm:$0xff] %vm266_vm1, %v1949_v63 }
 0x51b   : > { %v1997_v50 = vpop.permute.xlu1 (!%p2173_p4), %1996 }
 0x51c   : > { %v1953_v45 = vpop.permute.xlu0 %1952  ;;  %v2018_v13 = vsel (!%p2173_p4), %vm266_vm1, %v1945_v56, %v1997_v50 }
 0x51d   : > { %1970 = vst.msk [vmem:[#allocation2 + $0x30] sm:$0xff] %vm266_vm1, %v1953_v45 }
 0x51e   : > { %2026 = vst.msk [vmem:[%s3655_s6 + $0x10] sm:$0xff] %vm468_vm2, %v2018_v13 }
 0x51f   : > { %v1999_v3 = vpop.permute.xlu1 %1998 }
 0x520   : > { %v1993_v26 = vpop.permute.xlu0 %1992  ;;  %v2019_v4 = vsel %vm266_vm1, %v1947_v37, %v1999_v3 }
 0x521   : > { %v2016_v42 = vsel %vm266_vm1, %v1941_v55, %v1993_v26  ;;  %2027 = vst.msk [vmem:[%s3655_s6 + $0x18] sm:$0xff] %vm468_vm2, %v2019_v4 }
 0x522   : > { %2024 = vst.msk [vmem:[%s3655_s6] sm:$0xff] %vm468_vm2, %v2016_v42 }
 0x523   : > { %v2003_v5 = vpop.permute.xlu1 %2002 }
 0x524   : > { %v1995_v47 = vpop.permute.xlu0 %1994  ;;  %v2021_v53 = vsel %vm266_vm1, %v1951_v49, %v2003_v5 }
 0x525   : > { %v2017_v11 = vsel %vm266_vm1, %v1943_v2, %v1995_v47  ;;  %2029 = vst.msk [vmem:[%s3655_s6 + $0x28] sm:$0xff] %vm468_vm2, %v2021_v53 }
 0x526   : > { %2025 = vst.msk [vmem:[%s3655_s6 + $0x8] sm:$0xff] %vm468_vm2, %v2017_v11 }
 0x527   : > { %v2007_v32 = vpop.permute.xlu1 %2006 }
 0x528   : > { %v2001_v60 = vpop.permute.xlu0 %2000  ;;  %v2023_v61 = vsel %vm266_vm1, %v1955_v28, %v2007_v32 }
 0x529   : > { %v2020_v30 = vsel %vm266_vm1, %v1949_v63, %v2001_v60  ;;  %2031 = vst.msk [vmem:[%s3655_s6 + $0x38] sm:$0xff] %vm468_vm2, %v2023_v61 }
 0x52a   : > { %2028 = vst.msk [vmem:[%s3655_s6 + $0x20] sm:$0xff] %vm468_vm2, %v2020_v30 }
 0x52c   : > { %v2005_v25 = vpop.permute.xlu0 %2004 }
 0x52d   : > { %v2022_v43 = vsel %vm266_vm1, %v1953_v45, %v2005_v25 }
 0x52e   : > { %2030 = vst.msk [vmem:[%s3655_s6 + $0x30] sm:$0xff] %vm468_vm2, %v2022_v43 }
 0x52f PF: > { %s16_s21 = sadd.s32 1, %s2789_s21  }
 0x530   : > { %p13_p5 = scmp.ge.s32.totalorder %s16_s21, 5  }
 0x532   :  { %15 = sbr.rel (!%p13_p5) target bundleno = 1 (0x1), region = 78 }

</bundles_post_ra>
